<compile_context>
chip_gen: v7x
topology: tpu7x:2x2x1
jax: 0.10.0
libtpu: 0.0.40
codegen_flags: <defaults>
</compile_context>

<pallas_src>
import functools
import math

import jax
import jax.numpy as jnp
from jax.experimental import pallas as pl
from jax.experimental.pallas import tpu as pltpu


def _round_up(x, m):
    return ((x + m - 1) // m) * m


def _choose_tq(L, score_budget_bytes=4 << 20):
    """Largest query-tile size that (a) divides L (no padding / masking),
    (b) is a multiple of 8 (or the whole frame) and (c) keeps the (tq, L) f32
    score tile under budget."""
    max_rows = max(8, score_budget_bytes // (4 * L))
    if L <= max_rows:
        return L
    cap = (min(max_rows, L) // 8) * 8
    for tq in range(cap, 0, -8):
        if L % tq == 0:
            return tq
    return L   # no aligned divisor -> whole frame as a single tile


def _vmem_limit_bytes(L, cp, tq):
    est = (2 * L * cp * 4        # x frame block (double-buffered)
           + 3 * L * cp * 2      # q/k/v VMEM scratch
           + 2 * tq * cp * 4     # output block (double-buffered)
           + 8 * cp * cp * 2     # weight / bias blocks
           + 4 * tq * L * 4)     # softmax temporaries headroom
    est = int(est * 1.5) + (2 << 20)
    return max(32 << 20, min(est, 60 << 20))   # v7x has 64 MiB per TC


# ----------------------------------------------------------------------------
# Fused kernel: RMS-norm + merged QKV + attention + proj + residual (per frame)
# ----------------------------------------------------------------------------

def _fused_attn_kernel(x_ref, g_ref, wqkv_ref, bqkv_ref, wp_ref, bp_ref,
                       o_ref, q_sc, k_sc, v_sc, *, rms_scale, attn_scale):
    qi = pl.program_id(1)
    tq = o_ref.shape[1]
    L, cp = q_sc.shape

    # --- Phase 1 (once per frame): RMS-norm + merged QKV into VMEM scratch ---
    @pl.when(qi == 0)
    def _():
        x = x_ref[0]                                       # (L, cp) f32
        ssq = jnp.sum(x * x, axis=-1, keepdims=True)
        inv = jax.lax.rsqrt(jnp.maximum(ssq, 1e-24))       # == 1/max(||x||,1e-12)
        xn = (x * inv * rms_scale * g_ref[...]).astype(jnp.bfloat16)
        qkv = jnp.dot(xn, wqkv_ref[...],
                      preferred_element_type=jnp.float32) + bqkv_ref[...]
        # 128-lane-aligned slices of the merged matmul output (layout-free).
        q_sc[...] = (qkv[:, :cp] * attn_scale).astype(q_sc.dtype)  # fold 1/sqrt(C)
        k_sc[...] = qkv[:, cp:2 * cp].astype(k_sc.dtype)
        v_sc[...] = qkv[:, 2 * cp:].astype(v_sc.dtype)

    # --- Phase 2: this query tile against the frame-resident K/V -------------
    start = pl.multiple_of(qi * tq, tq)
    q = q_sc[pl.ds(start, tq), :]                          # (tq, cp) bf16
    s = jax.lax.dot_general(q, k_sc[...], (((1,), (1,)), ((), ())),
                            preferred_element_type=jnp.float32)     # (tq, L)
    m = jnp.max(s, axis=-1, keepdims=True)
    p = jnp.exp(s - m)                                     # f32 (safe on v5e too)
    l = jnp.sum(p, axis=-1, keepdims=True)
    o = jnp.dot(p.astype(v_sc.dtype), v_sc[...],
                preferred_element_type=jnp.float32)
    o = o * pl.reciprocal(l, approx=True)                  # EUP slot

    # --- Phase 3: output projection + bias + residual, single store ----------
    res = x_ref[0, pl.ds(start, tq), :]                    # (tq, cp) f32 residual
    out = jnp.dot(o.astype(jnp.bfloat16), wp_ref[...],
                  preferred_element_type=jnp.float32) + bp_ref[...] + res
    o_ref[0] = out.astype(o_ref.dtype)


# ----------------------------------------------------------------------------
# AttentionBlock forward (functional)
# ----------------------------------------------------------------------------

def attention_block(params, x):
    b, c, t, h, w = x.shape
    L = h * w
    bt = b * t
    cp = _round_up(c, 128)

    # Channel-last token layout (bt, L, cp); also serves as the residual.
    # TODO(synk): the surrounding model could keep channel-last activations and
    # skip this transpose (it is the only extra full-tensor HBM pass left).
    xt = x.transpose(0, 2, 3, 4, 1).reshape(bt, L, c).astype(jnp.float32)
    if cp != c:
        xt = jnp.pad(xt, ((0, 0), (0, 0), (0, cp - c)))

    gamma = jnp.pad(params["gamma"].astype(jnp.float32).reshape(-1),
                    (0, cp - c)).reshape(1, cp)

    wqkv = params["qkv_w"].reshape(3 * c, c).astype(jnp.float32)
    bqkv = params["qkv_b"].astype(jnp.float32)

    def pad_w(wm):   # (c, c) -> (cp, cp); padded rows/cols contribute zero
        return jnp.pad(wm, ((0, cp - c), (0, cp - c)))

    def pad_b(bv_):  # (c,) -> (cp,)
        return jnp.pad(bv_, (0, cp - c))

    # Merged (cp, 3*cp) QKV weight: one MXU-filling matmul, lane-aligned slices.
    w_qkv = jnp.concatenate(
        [pad_w(wqkv[:c].T), pad_w(wqkv[c:2 * c].T), pad_w(wqkv[2 * c:].T)],
        axis=1).astype(jnp.bfloat16)
    b_qkv = jnp.concatenate(
        [pad_b(bqkv[:c]), pad_b(bqkv[c:2 * c]), pad_b(bqkv[2 * c:])]
    ).reshape(1, 3 * cp)

    w_proj = pad_w(params["proj_w"].reshape(c, c).astype(jnp.float32).T
                   ).astype(jnp.bfloat16)
    b_proj = pad_b(params["proj_b"].astype(jnp.float32)).reshape(1, cp)

    tq = _choose_tq(L)
    nq = L // tq

    out3d = pl.pallas_call(
        functools.partial(_fused_attn_kernel,
                          rms_scale=float(math.sqrt(c)),
                          attn_scale=float(1.0 / math.sqrt(c))),
        out_shape=jax.ShapeDtypeStruct((bt, L, cp), jnp.float32),
        grid_spec=pltpu.PrefetchScalarGridSpec(
            num_scalar_prefetch=0,
            grid=(bt, nq),
            in_specs=[
                pl.BlockSpec((1, L, cp), lambda bi, qi: (bi, 0, 0)),   # frame x
                pl.BlockSpec((1, cp), lambda bi, qi: (0, 0)),          # gamma
                pl.BlockSpec((cp, 3 * cp), lambda bi, qi: (0, 0)),     # Wqkv
                pl.BlockSpec((1, 3 * cp), lambda bi, qi: (0, 0)),      # bqkv
                pl.BlockSpec((cp, cp), lambda bi, qi: (0, 0)),         # Wproj
                pl.BlockSpec((1, cp), lambda bi, qi: (0, 0)),          # bproj
            ],
            out_specs=pl.BlockSpec((1, tq, cp), lambda bi, qi: (bi, qi, 0)),
            scratch_shapes=[
                pltpu.VMEM((L, cp), jnp.bfloat16),   # q (pre-scaled), per frame
                pltpu.VMEM((L, cp), jnp.bfloat16),   # k, per frame
                pltpu.VMEM((L, cp), jnp.bfloat16),   # v, per frame
            ],
        ),
        compiler_params=pltpu.CompilerParams(
            dimension_semantics=("parallel", "arbitrary"),
            vmem_limit_bytes=_vmem_limit_bytes(L, cp, tq)),
    )(xt, gamma, w_qkv, b_qkv, w_proj, b_proj)

    out = out3d[..., :c].reshape(b, t, h, w, c).transpose(0, 4, 1, 2, 3)
    return out


# ----------------------------------------------------------------------------
# Pure-JAX reference (for numerical validation)
# ----------------------------------------------------------------------------

def attention_block_ref(params, x):
    b, c, t, h, w = x.shape
    xt = x.transpose(0, 2, 3, 4, 1).reshape(b * t, h * w, c).astype(jnp.float32)
    nrm = jnp.sqrt(jnp.sum(xt * xt, axis=-1, keepdims=True))
    xn = xt / jnp.maximum(nrm, 1e-12) * math.sqrt(c) * params["gamma"].reshape(-1)
    wqkv = params["qkv_w"].reshape(3 * c, c)
    qkv = xn @ wqkv.T + params["qkv_b"]
    q, k, v = qkv[..., :c], qkv[..., c:2 * c], qkv[..., 2 * c:]
    s = (q @ jnp.swapaxes(k, -1, -2)) / math.sqrt(c)
    p = jax.nn.softmax(s, axis=-1)
    o = p @ v
    o = o @ params["proj_w"].reshape(c, c).T + params["proj_b"]
    o = o.reshape(b, t, h, w, c).transpose(0, 4, 1, 2, 3)
    return o + x


# ----------------------------------------------------------------------------
# Parameter init (mirrors the PyTorch module's __init__)
# ----------------------------------------------------------------------------

def init_attention_block(key, dim, zero_proj=True):
    k1, k2, k3, k4 = jax.random.split(key, 4)
    bound = 1.0 / math.sqrt(dim)   # Conv2d(k=1) default init bounds
    qkv_w = jax.random.uniform(k1, (3 * dim, dim, 1, 1), jnp.float32, -bound, bound)
    qkv_b = jax.random.uniform(k2, (3 * dim,), jnp.float32, -bound, bound)
    if zero_proj:  # nn.init.zeros_(self.proj.weight)
        proj_w = jnp.zeros((dim, dim, 1, 1), jnp.float32)
    else:
        proj_w = jax.random.uniform(k3, (dim, dim, 1, 1), jnp.float32, -bound, bound)
    proj_b = jax.random.uniform(k4, (dim,), jnp.float32, -bound, bound)
    return {"gamma": jnp.ones((dim,), jnp.float32),       # RMS_norm gamma (dim,1,1)
            "qkv_w": qkv_w, "qkv_b": qkv_b,
            "proj_w": proj_w, "proj_b": proj_b}


# ----------------------------------------------------------------------------
# Main
# ----------------------------------------------------------------------------

if __name__ == "__main__":
    dim = 128                   # attention channel dim (lane-aligned)
    b, t, h, w = 2, 2, 16, 16   # -> 4 frames of 256 tokens each

    key = jax.random.PRNGKey(0)
    kx, kp, kc = jax.random.split(key, 3)
    x = jax.random.normal(kx, (b, dim, t, h, w), jnp.float32)

    fwd = jax.jit(attention_block)

    # Faithful module init (proj weight zero-initialized, as in the PyTorch code).
    params = init_attention_block(kp, dim, zero_proj=True)
    out = jax.block_until_ready(fwd(params, x))
    assert out.shape == x.shape, out.shape
    assert bool(jnp.all(jnp.isfinite(out)))

    # Numerical validation with a non-zero proj weight so the full
    # norm -> qkv -> attention -> proj -> residual path is exercised.
    params_chk = init_attention_block(kc, dim, zero_proj=False)
    out_chk = jax.block_until_ready(fwd(params_chk, x))
    ref = attention_block_ref(params_chk, x)
    assert bool(jnp.allclose(out_chk, ref, rtol=5e-2, atol=1.5e-1)), \
        float(jnp.max(jnp.abs(out_chk - ref)))

    print("KERNEL_OK")
</pallas_src>

<mosaic_0001>
module attributes {stable_mosaic.version = 11 : i64} {
  func.func @_fused_attn_kernel(%arg0: i32, %arg1: i32, %arg2: memref<1x256x128xf32, #tpu.memory_space<vmem>>, %arg3: memref<1x128xf32, #tpu.memory_space<vmem>>, %arg4: memref<128x384xbf16, #tpu.memory_space<vmem>>, %arg5: memref<1x384xf32, #tpu.memory_space<vmem>>, %arg6: memref<128x128xbf16, #tpu.memory_space<vmem>>, %arg7: memref<1x128xf32, #tpu.memory_space<vmem>>, %arg8: memref<1x256x128xf32, #tpu.memory_space<vmem>>, %arg9: memref<256x128xbf16, #tpu.memory_space<vmem>>, %arg10: memref<256x128xbf16, #tpu.memory_space<vmem>>, %arg11: memref<256x128xbf16, #tpu.memory_space<vmem>>) attributes {dimension_semantics = [#tpu.dimension_semantics<parallel>, #tpu.dimension_semantics<arbitrary>], iteration_bounds = array<i64: 4, 1>, scalar_prefetch = 0 : i64, scratch_operands = 3 : i64, tpu.core_type = #tpu.core_type<tc>, window_params = [{transform_indices = @transform_0, window_bounds = array<i64: 1, 256, 128>}, {pipeline_mode = #tpu.pipeline_mode<synchronous>, transform_indices = @transform_1, window_bounds = array<i64: 1, 128>}, {pipeline_mode = #tpu.pipeline_mode<synchronous>, transform_indices = @transform_2, window_bounds = array<i64: 128, 384>}, {pipeline_mode = #tpu.pipeline_mode<synchronous>, transform_indices = @transform_3, window_bounds = array<i64: 1, 384>}, {pipeline_mode = #tpu.pipeline_mode<synchronous>, transform_indices = @transform_4, window_bounds = array<i64: 128, 128>}, {pipeline_mode = #tpu.pipeline_mode<synchronous>, transform_indices = @transform_5, window_bounds = array<i64: 1, 128>}, {transform_indices = @transform_6, window_bounds = array<i64: 1, 256, 128>}]} {
    %c0_i32 = arith.constant 0 : i32
    %0 = arith.cmpi eq, %arg1, %c0_i32 : i32
    %1 = arith.extui %0 : i1 to i32
    %c0_i32_0 = arith.constant 0 : i32
    %2 = arith.cmpi ne, %1, %c0_i32_0 : i32
    scf.if %2 {
      %c0_18 = arith.constant 0 : index
      %c0_19 = arith.constant 0 : index
      %c0_20 = arith.constant 0 : index
      %35 = vector.load %arg2[%c0_18, %c0_19, %c0_20] : memref<1x256x128xf32, #tpu.memory_space<vmem>>, vector<1x256x128xf32>
      %36 = vector.shape_cast %35 : vector<1x256x128xf32> to vector<256x128xf32>
      %37 = arith.mulf %36, %36 : vector<256x128xf32>
      %cst_21 = arith.constant dense<0.000000e+00> : vector<256xf32>
      %38 = vector.multi_reduction <add>, %37, %cst_21 [1] : vector<256x128xf32> to vector<256xf32>
      %39 = vector.shape_cast %38 : vector<256xf32> to vector<256x1xf32>
      %cst_22 = arith.constant 1.000000e-24 : f32
      %40 = vector.broadcast %cst_22 : f32 to vector<256x1xf32>
      %41 = arith.maximumf %39, %40 : vector<256x1xf32>
      %42 = math.rsqrt %41 : vector<256x1xf32>
      %43 = vector.broadcast %42 : vector<256x1xf32> to vector<256x128xf32>
      %44 = arith.mulf %36, %43 : vector<256x128xf32>
      %cst_23 = arith.constant 11.3137083 : f32
      %45 = vector.broadcast %cst_23 : f32 to vector<256x128xf32>
      %46 = arith.mulf %44, %45 : vector<256x128xf32>
      %c0_24 = arith.constant 0 : index
      %c0_25 = arith.constant 0 : index
      %47 = vector.load %arg3[%c0_24, %c0_25] : memref<1x128xf32, #tpu.memory_space<vmem>>, vector<1x128xf32>
      %48 = vector.broadcast %47 : vector<1x128xf32> to vector<256x128xf32>
      %49 = arith.mulf %46, %48 : vector<256x128xf32>
      %50 = arith.truncf %49 : vector<256x128xf32> to vector<256x128xbf16>
      %c0_26 = arith.constant 0 : index
      %c0_27 = arith.constant 0 : index
      %51 = vector.load %arg4[%c0_26, %c0_27] : memref<128x384xbf16, #tpu.memory_space<vmem>>, vector<128x384xbf16>
      %cst_28 = arith.constant dense<0.000000e+00> : vector<256x384xf32>
      %52 = tpu.matmul %50, %51, %cst_28 {dimension_numbers = #tpu.dot_dimension_numbers<[1], [0], [0], [1], [0, 0, 1, 1], [], []>} : vector<256x128xbf16>, vector<128x384xbf16>, vector<256x384xf32> -> vector<256x384xf32>
      %c0_29 = arith.constant 0 : index
      %c0_30 = arith.constant 0 : index
      %53 = vector.load %arg5[%c0_29, %c0_30] : memref<1x384xf32, #tpu.memory_space<vmem>>, vector<1x384xf32>
      %54 = vector.broadcast %53 : vector<1x384xf32> to vector<256x384xf32>
      %55 = arith.addf %52, %54 : vector<256x384xf32>
      %56 = vector.extract_strided_slice %55 {offsets = [0, 0], sizes = [256, 128], strides = [1, 1]} : vector<256x384xf32> to vector<256x128xf32>
      %cst_31 = arith.constant 0.0883883461 : f32
      %57 = vector.broadcast %cst_31 : f32 to vector<256x128xf32>
      %58 = arith.mulf %56, %57 : vector<256x128xf32>
      %59 = arith.truncf %58 : vector<256x128xf32> to vector<256x128xbf16>
      %c0_32 = arith.constant 0 : index
      %c0_33 = arith.constant 0 : index
      %60 = vector.load %arg9[%c0_32, %c0_33] : memref<256x128xbf16, #tpu.memory_space<vmem>>, vector<256x128xbf16>
      tpu.vector_store %arg9[%c0_32, %c0_33], %59 {strides = array<i32>} : memref<256x128xbf16, #tpu.memory_space<vmem>>, vector<256x128xbf16>,
      %61 = vector.extract_strided_slice %55 {offsets = [0, 128], sizes = [256, 128], strides = [1, 1]} : vector<256x384xf32> to vector<256x128xf32>
      %62 = arith.truncf %61 : vector<256x128xf32> to vector<256x128xbf16>
      %c0_34 = arith.constant 0 : index
      %c0_35 = arith.constant 0 : index
      %63 = vector.load %arg10[%c0_34, %c0_35] : memref<256x128xbf16, #tpu.memory_space<vmem>>, vector<256x128xbf16>
      tpu.vector_store %arg10[%c0_34, %c0_35], %62 {strides = array<i32>} : memref<256x128xbf16, #tpu.memory_space<vmem>>, vector<256x128xbf16>,
      %64 = vector.extract_strided_slice %55 {offsets = [0, 256], sizes = [256, 128], strides = [1, 1]} : vector<256x384xf32> to vector<256x128xf32>
      %65 = arith.truncf %64 : vector<256x128xf32> to vector<256x128xbf16>
      %c0_36 = arith.constant 0 : index
      %c0_37 = arith.constant 0 : index
      %66 = vector.load %arg11[%c0_36, %c0_37] : memref<256x128xbf16, #tpu.memory_space<vmem>>, vector<256x128xbf16>
      tpu.vector_store %arg11[%c0_36, %c0_37], %65 {strides = array<i32>} : memref<256x128xbf16, #tpu.memory_space<vmem>>, vector<256x128xbf16>,
    } else {
    }
    %c256_i32 = arith.constant 256 : i32
    %3 = arith.muli %arg1, %c256_i32 : i32
    %4 = tpu.assume_multiple %3, 256 : i32
    %5 = arith.index_cast %4 : i32 to index
    %c0 = arith.constant 0 : index
    %6 = vector.load %arg9[%5, %c0] : memref<256x128xbf16, #tpu.memory_space<vmem>>, vector<256x128xbf16>
    %c0_1 = arith.constant 0 : index
    %c0_2 = arith.constant 0 : index
    %7 = vector.load %arg10[%c0_1, %c0_2] : memref<256x128xbf16, #tpu.memory_space<vmem>>, vector<256x128xbf16>
    %cst = arith.constant dense<0.000000e+00> : vector<256x256xf32>
    %8 = tpu.matmul %6, %7, %cst {dimension_numbers = #tpu.dot_dimension_numbers<[1], [1], [0], [0], [0, 0, 1, 0], [], []>} : vector<256x128xbf16>, vector<256x128xbf16>, vector<256x256xf32> -> vector<256x256xf32>
    %cst_3 = arith.constant dense<0xFF800000> : vector<256xf32>
    %9 = vector.multi_reduction <maximumf>, %8, %cst_3 [1] : vector<256x256xf32> to vector<256xf32>
    %10 = vector.shape_cast %9 : vector<256xf32> to vector<256x1xf32>
    %11 = vector.broadcast %10 : vector<256x1xf32> to vector<256x256xf32>
    %12 = arith.subf %8, %11 : vector<256x256xf32>
    %13 = math.exp %12 : vector<256x256xf32>
    %cst_4 = arith.constant dense<0.000000e+00> : vector<256xf32>
    %14 = vector.multi_reduction <add>, %13, %cst_4 [1] : vector<256x256xf32> to vector<256xf32>
    %15 = vector.shape_cast %14 : vector<256xf32> to vector<256x1xf32>
    %16 = arith.truncf %13 : vector<256x256xf32> to vector<256x256xbf16>
    %c0_5 = arith.constant 0 : index
    %c0_6 = arith.constant 0 : index
    %17 = vector.load %arg11[%c0_5, %c0_6] : memref<256x128xbf16, #tpu.memory_space<vmem>>, vector<256x128xbf16>
    %cst_7 = arith.constant dense<0.000000e+00> : vector<256x128xf32>
    %18 = tpu.matmul %16, %17, %cst_7 {dimension_numbers = #tpu.dot_dimension_numbers<[1], [0], [0], [1], [0, 0, 1, 1], [], []>} : vector<256x256xbf16>, vector<256x128xbf16>, vector<256x128xf32> -> vector<256x128xf32>
    %19 = tpu.reciprocal %15 {approx = true} : vector<256x1xf32> -> vector<256x1xf32>
    %20 = vector.broadcast %19 : vector<256x1xf32> to vector<256x128xf32>
    %21 = arith.mulf %18, %20 : vector<256x128xf32>
    %c0_8 = arith.constant 0 : index
    %22 = arith.index_cast %4 : i32 to index
    %c0_9 = arith.constant 0 : index
    %23 = vector.load %arg2[%c0_8, %22, %c0_9] : memref<1x256x128xf32, #tpu.memory_space<vmem>>, vector<1x256x128xf32>
    %24 = vector.shape_cast %23 : vector<1x256x128xf32> to vector<256x128xf32>
    %25 = arith.truncf %21 : vector<256x128xf32> to vector<256x128xbf16>
    %c0_10 = arith.constant 0 : index
    %c0_11 = arith.constant 0 : index
    %26 = vector.load %arg6[%c0_10, %c0_11] : memref<128x128xbf16, #tpu.memory_space<vmem>>, vector<128x128xbf16>
    %cst_12 = arith.constant dense<0.000000e+00> : vector<256x128xf32>
    %27 = tpu.matmul %25, %26, %cst_12 {dimension_numbers = #tpu.dot_dimension_numbers<[1], [0], [0], [1], [0, 0, 1, 1], [], []>} : vector<256x128xbf16>, vector<128x128xbf16>, vector<256x128xf32> -> vector<256x128xf32>
    %c0_13 = arith.constant 0 : index
    %c0_14 = arith.constant 0 : index
    %28 = vector.load %arg7[%c0_13, %c0_14] : memref<1x128xf32, #tpu.memory_space<vmem>>, vector<1x128xf32>
    %29 = vector.broadcast %28 : vector<1x128xf32> to vector<256x128xf32>
    %30 = arith.addf %27, %29 : vector<256x128xf32>
    %31 = arith.addf %30, %24 : vector<256x128xf32>
    %c0_15 = arith.constant 0 : index
    %c0_16 = arith.constant 0 : index
    %c0_17 = arith.constant 0 : index
    %32 = vector.load %arg8[%c0_15, %c0_16, %c0_17] : memref<1x256x128xf32, #tpu.memory_space<vmem>>, vector<1x256x128xf32>
    %33 = vector.shape_cast %32 : vector<1x256x128xf32> to vector<256x128xf32>
    %34 = vector.shape_cast %31 : vector<256x128xf32> to vector<1x256x128xf32>
    tpu.vector_store %arg8[%c0_15, %c0_16, %c0_17], %34 {strides = array<i32>} : memref<1x256x128xf32, #tpu.memory_space<vmem>>, vector<1x256x128xf32>,
    return
  }
  func.func @transform_0(%arg0: i32, %arg1: i32) -> (i32, i32, i32) {
    %c0_i32 = arith.constant 0 : i32
    %c0_i32_0 = arith.constant 0 : i32
    %c0_i32_1 = arith.constant 0 : i32
    return %arg0, %c0_i32, %c0_i32_0 : i32, i32, i32
  }
  func.func @transform_1(%arg0: i32, %arg1: i32) -> (i32, i32) {
    %c0_i32 = arith.constant 0 : i32
    %c0_i32_0 = arith.constant 0 : i32
    %c0_i32_1 = arith.constant 0 : i32
    return %c0_i32, %c0_i32_0 : i32, i32
  }
  func.func @transform_2(%arg0: i32, %arg1: i32) -> (i32, i32) {
    %c0_i32 = arith.constant 0 : i32
    %c0_i32_0 = arith.constant 0 : i32
    %c0_i32_1 = arith.constant 0 : i32
    return %c0_i32, %c0_i32_0 : i32, i32
  }
  func.func @transform_3(%arg0: i32, %arg1: i32) -> (i32, i32) {
    %c0_i32 = arith.constant 0 : i32
    %c0_i32_0 = arith.constant 0 : i32
    %c0_i32_1 = arith.constant 0 : i32
    return %c0_i32, %c0_i32_0 : i32, i32
  }
  func.func @transform_4(%arg0: i32, %arg1: i32) -> (i32, i32) {
    %c0_i32 = arith.constant 0 : i32
    %c0_i32_0 = arith.constant 0 : i32
    %c0_i32_1 = arith.constant 0 : i32
    return %c0_i32, %c0_i32_0 : i32, i32
  }
  func.func @transform_5(%arg0: i32, %arg1: i32) -> (i32, i32) {
    %c0_i32 = arith.constant 0 : i32
    %c0_i32_0 = arith.constant 0 : i32
    %c0_i32_1 = arith.constant 0 : i32
    return %c0_i32, %c0_i32_0 : i32, i32
  }
  func.func @transform_6(%arg0: i32, %arg1: i32) -> (i32, i32, i32) {
    %c0_i32 = arith.constant 0 : i32
    %c0_i32_0 = arith.constant 0 : i32
    return %arg0, %arg1, %c0_i32 : i32, i32, i32
  }
}

</mosaic_0001>

<bundles_post_ra>
// kernel: attention_block.1
= control target key start
LH: loop header
LB: loop body
LE: loop exit
PB: predicated region body
PF: predicated region fallthrough
CT: control target
= control target key end

     0   :  { %11 = vsyncpa [#allocation6], 0  ;;  %s4542_s0 = inlined_call_operand.vmem [shape: f32[4,256,128], index: 0, kind: input, shape index: {}]   ;;  %s4543_s1 = inlined_call_operand.vmem [shape: f32[1,128], index: 1, kind: input, shape index: {}]   ;;  %s4544_s2 = inlined_call_operand.vmem [shape: bf16[128,384], index: 2, kind: input, shape index: {}]   ;;  %s4545_s3 = inlined_call_operand.vmem [shape: f32[1,384], index: 3, kind: input, shape index: {}]   ;;  %s4546_s4 = inlined_call_operand.vmem [shape: bf16[128,128], index: 4, kind: input, shape index: {}]   ;;  %s4547_s5 = inlined_call_operand.vmem [shape: f32[1,128], index: 5, kind: input, shape index: {}]   ;;  %s4548_s6 = inlined_call_operand.hbm [shape: f32[4,256,128], index: 6, kind: output, shape index: {}]  }
   0x1   :  { %13 = vsyncpa [#allocation6 + $0x1], 0  ;;  %s3391_s21 = smov 0   ;;  %s3393_s22 = smov 0  }
   0x2   :  { %s3395_s23 = smov 0   ;;  %s3397_s24 = smov 0  }
   0x3   :  { %s3399_s25 = smov 0   ;;  %s3401_s26 = smov 0  }
   0x4 LB: > { %s2565_s27 = sadd.s32 4294967295, %s3350_s26   ;;  %s2566_s28 = sadd.s32 4294967294, %s3350_s26   ;;  %s3350_s26 = sphi %s3401_s26, %s19_s26   ;;  %s3346_s25 = sphi %s3399_s25, %s4594_s25   ;;  %s3342_s24 = sphi %s3397_s24, %s4593_s24   ;;  %s3338_s23 = sphi %s3395_s23, %s4592_s23   ;;  %s3334_s22 = sphi %s3393_s22, %s4591_s22   ;;  %s3330_s21 = sphi %s3391_s21, %s4590_s21  }
   0x5   : > { %s31_s29 = sadd.s32 1, %s3346_s25  ;;  %s171_s30 = sadd.s32 1, %s3338_s23 }
   0x6   : > { %p33_p0 = scmp.ge.s32.totalorder %s31_s29, 4  ;;  %p181_p1 = scmp.ne.s32.totalorder %s3338_s23, %s3334_s22 }
   0x7   : > { %p182_p2 = scmp.eq.s32.totalorder %s2565_s27, 3  ;;  %p187_p3 = scmp.ne.s32.totalorder %s3334_s22, %s3330_s21 }
   0x8   : > { %s4596_s29 = smov (%p33_p0, %s31_s29), 0  ;;  %p188_p5 = scmp.eq.s32.totalorder %s2566_s28, 3 }
   0x9   : > { %p3431_p4 = por %p182_p2, %p181_p1  ;;  %s166_s8 = ssub.s32 %s3346_s25, %s4596_s29 }
   0xa   : > { %p2569_p6 = scmp.ge.s32.totalorder %s3350_s26, 1  ;;  %p169_p7 = scmp.eq.s32.totalorder %s166_s8, 0 }
   0xb   : > { %p3438_p8 = por %p188_p5, %p187_p3  ;;  %p229_p9 = scmp.lt.s32.totalorder %s3350_s26, 5 }
   0xc   : > { %s3444_s10 = scalar_select %p169_p7, %s3338_s23, %s171_s30  }
   0xd   : > { %p230_p10 = pnand %p2569_p6, %p229_p9 }
   0xf   : > { %233 = sbr.rel (%p230_p10) target bundleno = 1499 (0x5db), region = 44 }
  0x16   : > { %p259_p11 = scmp.lt.s32.totalorder %s3342_s24, 3  ;;  %v2976_v0 = vld [vmem:[%s4544_s2 + $0x4] ss:$12 sps:$4 sm:$0xff]   ;;  %v2978_v1 = vld [vmem:[%s4544_s2] ss:$12 sps:$4 sm:$0xff]   ;;  %s256_s18 = sand.u32 1, %s3334_s22  }
  0x17   : > { %758 = vmatprep.subr.bf16.mxu0 %v2976_v0  ;;  %v2979_v2 = vld [vmem:[%s4544_s2 + $0x8] ss:$12 sps:$4 sm:$0xff]   ;;  %v2982_v4 = vld [vmem:[%s4544_s2 + $0x18] ss:$12 sps:$4 sm:$0xff]   ;;  %v2983_v5 = vld [vmem:[%s4544_s2 + $0x20] ss:$12 sps:$4 sm:$0xff]  }
  0x18   : > { %s260_s15 = scalar_select %p259_p11, %s3342_s24, 3  ;;  %759 = vmatpush1.bf16.msra.mxu0 %v2978_v1  ;;  %v2980_v3 = vld [vmem:[%s4544_s2 + $0x1c] ss:$12 sps:$4 sm:$0xff]   ;;  %2822 = vmatprep.subr.bf16.mxu1 %v2979_v2  ;;  %v2984_v28 = vld [vmem:[%s4544_s2 + $0x34] ss:$12 sps:$4 sm:$0xff]  }
  0x19   : > { %2823 = vmatpush3.bf16.msra.mxu1 %v2979_v2  ;;  %760 = vmatprep.subr.bf16.mxu0 %v2980_v3  ;;  %v2986_v29 = vld [vmem:[%s4544_s2 + $0x30] ss:$12 sps:$4 sm:$0xff]   ;;  %v2987_v30 = vld [vmem:[%s4544_s2 + $0x38] ss:$12 sps:$4 sm:$0xff]   ;;  %v2990_v36 = vld [vmem:[%s4544_s2 + $0x48] ss:$12 sps:$4 sm:$0xff]  }
  0x1a   : > { %s2612_s28 = sshll.u32 %s260_s15, 8  ;;  %2824 = vmatprep.subr.bf16.mxu1 %v2983_v5  ;;  %v2988_v35 = vld [vmem:[%s4544_s2 + $0x4c] ss:$12 sps:$4 sm:$0xff]   ;;  %v2991_v37 = vld [vmem:[%s4544_s2 + $0x50] ss:$12 sps:$4 sm:$0xff]   ;;  %s2570_s27 = sshll.u32 %s256_s18, 8 }
  0x1b   : > { %s3469_s13 = scalar_lea.vmem %s4542_s0, %s2612_s28  ;;  %v2992_v42 = vld [vmem:[%s4544_s2 + $0x64] ss:$12 sps:$4 sm:$0xff]   ;;  %v2994_v43 = vld [vmem:[%s4544_s2 + $0x60] ss:$12 sps:$4 sm:$0xff]   ;;  %v2995_v44 = vld [vmem:[%s4544_s2 + $0x68] ss:$12 sps:$4 sm:$0xff]  }
  0x1c   : > { %v3472_v6 = vld [vmem:[%s3469_s13] sm:$0xff]  ;;  %v3475_v7 = vld [vmem:[%s3469_s13 + $0x10] sm:$0xff]  ;;  %v3478_v8 = vld [vmem:[%s3469_s13 + $0x8] sm:$0xff]  ;;  %761 = vmatpush1.bf16.msra.mxu0 %v2982_v4  ;;  %s4395_s28 = scalar_lea.vmem [#allocation5], %s2570_s27  ;;  %s2613_s30 = sshll.u32 %s3342_s24, 12 }
  0x1d   : > { %v302_v9 = vmul.f32 %v3472_v6, %v3472_v6  ;;  %v304_v10 = vmul.f32 %v3475_v7, %v3475_v7  ;;  %v3485_v11 = vld [vmem:[%s3469_s13 + $0x18] sm:$0xff]  ;;  %v303_v12 = vmul.f32 %v3478_v8, %v3478_v8  ;;  %v3492_v14 = vld [vmem:[%s3469_s13 + $0x28] sm:$0xff]  ;;  %v3495_v15 = vld [vmem:[%s3469_s13 + $0x20] sm:$0xff]  ;;  %2825 = vmatpush3.bf16.msra.mxu1 %v2983_v5  ;;  %762 = vmatprep.subr.bf16.mxu0 %v2984_v28  ;;  %s2488_s8 = sshll.u32 %s4395_s28, 4  ;;  %s4487_s14 = scalar_lea.hbm %s4548_s6, %s2613_s30  ;;  %s4489_s8 = int_to_ptr.vmem [resolvable:$true] %s2488_s8 }
  0x1e   : > { %v305_v13 = vmul.f32 %v3485_v11, %v3485_v11  ;;  %v307_v16 = vmul.f32 %v3492_v14, %v3492_v14  ;;  %v306_v17 = vmul.f32 %v3495_v15, %v3495_v15  ;;  %v3502_v18 = vld [vmem:[%s3469_s13 + $0x38] sm:$0xff]  ;;  %v3505_v19 = vld [vmem:[%s3469_s13 + $0x30] sm:$0xff]  ;;  %v3508_v20 = vld [vmem:[%s3469_s13 + $0x48] sm:$0xff]  ;;  %2826 = vmatprep.subr.bf16.mxu1 %v2987_v30  ;;  %s4496_s24 = scalar_lea.sflag [#allocation6], %s256_s18  ;;  %s3353_s15 = smov [#allocation5]  }
  0x1f   : > { %334 = vadd.xlane.f32.xlu0 %v302_v9  ;;  %338 = vadd.xlane.f32.xlu1 %v304_v10  ;;  %v3511_v21 = vld [vmem:[%s3469_s13 + $0x40] sm:$0xff]  ;;  %v309_v22 = vmul.f32 %v3502_v18, %v3502_v18  ;;  %v308_v23 = vmul.f32 %v3505_v19, %v3505_v19  ;;  %v3518_v24 = vld [vmem:[%s3469_s13 + $0x58] sm:$0xff]  ;;  %v3521_v25 = vld [vmem:[%s3469_s13 + $0x50] sm:$0xff]  ;;  %v311_v26 = vmul.f32 %v3508_v20, %v3508_v20  ;;  %v3352_v9 = vmov 0   ;;  %s3276_s16 = sshll.u32 %s3353_s15, 4  ;;  %s3277_s16 = int_to_ptr.vmem [resolvable:$false] %s3276_s16 }
  0x20   : > { %v310_v27 = vmul.f32 %v3511_v21, %v3511_v21  ;;  %v3537_v31 = vld [vmem:[%s3469_s13 + $0x68] sm:$0xff]  ;;  %v3540_v32 = vld [vmem:[%s3469_s13 + $0x60] sm:$0xff]  ;;  %v313_v33 = vmul.f32 %v3518_v24, %v3518_v24  ;;  %v312_v34 = vmul.f32 %v3521_v25, %v3521_v25  ;;  %763 = vmatpush1.bf16.msra.mxu0 %v2986_v29  ;;  %v3556_v38 = vld [vmem:[%s3469_s13 + $0x78] sm:$0xff]  ;;  %790 = vmatprep.mubr.bf16.mxu0 %v3352_v9  ;;  %s3278_s17 = scalar_lea.vmem %s3277_s16, 8192  ;;  %p3279_p1 = scmp.lt.s32.totalorder %s4489_s8, %s3277_s16 }
  0x21   : > { %2827 = vmatpush3.bf16.msra.mxu1 %v2987_v30  ;;  %v3559_v39 = vld [vmem:[%s3469_s13 + $0x70] sm:$0xff]  ;;  %764 = vmatprep.subr.bf16.mxu0 %v2988_v35  ;;  %v315_v40 = vmul.f32 %v3537_v31, %v3537_v31  ;;  %v314_v41 = vmul.f32 %v3540_v32, %v3540_v32  ;;  %v317_v45 = vmul.f32 %v3556_v38, %v3556_v38  ;;  %v3579_v47 = vld [vmem:[%s3469_s13 + $0x88] sm:$0xff]  ;;  %v3582_v48 = vld [vmem:[%s3469_s13 + $0x80] sm:$0xff] }
  0x22   : > { %2828 = vmatprep.subr.bf16.mxu1 %v2991_v37  ;;  %v316_v46 = vmul.f32 %v3559_v39, %v3559_v39  ;;  %v2996_v49 = vld [vmem:[%s4544_s2 + $0x7c] ss:$12 sps:$4 sm:$0xff]   ;;  %v2998_v50 = vld [vmem:[%s4544_s2 + $0x78] ss:$12 sps:$4 sm:$0xff]   ;;  %v2999_v51 = vld [vmem:[%s4544_s2 + $0x80] ss:$12 sps:$4 sm:$0xff]   ;;  %v319_v52 = vmul.f32 %v3579_v47, %v3579_v47  ;;  %v318_v53 = vmul.f32 %v3582_v48, %v3582_v48 }
  0x23   : > { %336 = vadd.xlane.f32.xlu0 %v303_v12  ;;  %340 = vadd.xlane.f32.xlu1 %v305_v13  ;;  %v3598_v54 = vld [vmem:[%s3469_s13 + $0x98] sm:$0xff]  ;;  %v3601_v55 = vld [vmem:[%s3469_s13 + $0x90] sm:$0xff]  ;;  %v3617_v61 = vld [vmem:[%s3469_s13 + $0xa8] sm:$0xff] }
  0x24   : > { %765 = vmatpush1.bf16.msra.mxu0 %v2990_v36  ;;  %v3000_v56 = vld [vmem:[%s4544_s2 + $0x94] ss:$12 sps:$4 sm:$0xff]   ;;  %v3002_v57 = vld [vmem:[%s4544_s2 + $0x90] ss:$12 sps:$4 sm:$0xff]   ;;  %v3003_v58 = vld [vmem:[%s4544_s2 + $0x98] ss:$12 sps:$4 sm:$0xff]   ;;  %v321_v59 = vmul.f32 %v3598_v54, %v3598_v54  ;;  %v320_v60 = vmul.f32 %v3601_v55, %v3601_v55  ;;  %v323_v2 = vmul.f32 %v3617_v61, %v3617_v61 }
  0x25   : > { %2829 = vmatpush3.bf16.msra.mxu1 %v2991_v37  ;;  %766 = vmatprep.subr.bf16.mxu0 %v2992_v42  ;;  %v3620_v62 = vld [vmem:[%s3469_s13 + $0xa0] sm:$0xff]  ;;  %v3004_v63 = vld [vmem:[%s4544_s2 + $0xac] ss:$12 sps:$4 sm:$0xff]   ;;  %v3006_v0 = vld [vmem:[%s4544_s2 + $0xa8] ss:$12 sps:$4 sm:$0xff]  }
  0x26   : > { %2830 = vmatprep.subr.bf16.mxu1 %v2995_v44  ;;  %v3007_v1 = vld [vmem:[%s4544_s2 + $0xb0] ss:$12 sps:$4 sm:$0xff]   ;;  %v322_v3 = vmul.f32 %v3620_v62, %v3620_v62  ;;  %v3647_v13 = vld [vmem:[%s3469_s13 + $0xc8] sm:$0xff]  ;;  %v3670_v30 = vld [vmem:[%s3469_s13 + $0xe0] sm:$0xff] }
  0x27   : > { %344 = vadd.xlane.f32.xlu1 %v307_v16  ;;  %342 = vadd.xlane.f32.xlu0 %v306_v17  ;;  %v3636_v4 = vld [vmem:[%s3469_s13 + $0xb8] sm:$0xff]  ;;  %v3639_v5 = vld [vmem:[%s3469_s13 + $0xb0] sm:$0xff]  ;;  %v3650_v16 = vld [vmem:[%s3469_s13 + $0xc0] sm:$0xff]  ;;  %v327_v17 = vmul.f32 %v3647_v13, %v3647_v13 }
  0x28   : > { %767 = vmatpush1.bf16.msra.mxu0 %v2994_v43  ;;  %v325_v10 = vmul.f32 %v3636_v4, %v3636_v4  ;;  %v324_v12 = vmul.f32 %v3639_v5, %v3639_v5  ;;  %v3667_v29 = vld [vmem:[%s3469_s13 + $0xe8] sm:$0xff]  ;;  %v3677_v35 = vld [vmem:[%s3469_s13 + $0xf8] sm:$0xff]  ;;  %v3680_v36 = vld [vmem:[%s3469_s13 + $0xf0] sm:$0xff] }
  0x29   : > { %2831 = vmatpush3.bf16.msra.mxu1 %v2995_v44  ;;  %768 = vmatprep.subr.bf16.mxu0 %v2996_v49  ;;  %v333_v37 = vmul.f32 %v3677_v35, %v3677_v35 }
  0x2a   : > { %2832 = vmatprep.subr.bf16.mxu1 %v2999_v51 }
  0x2b   : > { %348 = vadd.xlane.f32.xlu1 %v309_v22  ;;  %346 = vadd.xlane.f32.xlu0 %v308_v23  ;;  %v326_v22 = vmul.f32 %v3650_v16, %v3650_v16  ;;  %v3657_v23 = vld [vmem:[%s3469_s13 + $0xd8] sm:$0xff] }
  0x2c   : > { %769 = vmatpush1.bf16.msra.mxu0 %v2998_v50 }
  0x2d   : > { %2833 = vmatpush3.bf16.msra.mxu1 %v2999_v51  ;;  %770 = vmatprep.subr.bf16.mxu0 %v3000_v56 }
  0x2e   : > { %2834 = vmatprep.subr.bf16.mxu1 %v3003_v58 }
  0x2f   : > { %352 = vadd.xlane.f32.xlu1 %v311_v26  ;;  %350 = vadd.xlane.f32.xlu0 %v310_v27  ;;  %v3660_v26 = vld [vmem:[%s3469_s13 + $0xd0] sm:$0xff]  ;;  %v329_v27 = vmul.f32 %v3657_v23, %v3657_v23 }
  0x30   : > { %771 = vmatpush1.bf16.msra.mxu0 %v3002_v57  ;;  %v328_v28 = vmul.f32 %v3660_v26, %v3660_v26 }
  0x31   : > { %2835 = vmatpush3.bf16.msra.mxu1 %v3003_v58  ;;  %772 = vmatprep.subr.bf16.mxu0 %v3004_v63 }
  0x32   : > { %2836 = vmatprep.subr.bf16.mxu1 %v3007_v1 }
  0x33   : > { %356 = vadd.xlane.f32.xlu1 %v313_v33  ;;  %354 = vadd.xlane.f32.xlu0 %v312_v34  ;;  %v331_v33 = vmul.f32 %v3667_v29, %v3667_v29  ;;  %v330_v34 = vmul.f32 %v3670_v30, %v3670_v30 }
  0x34   : > { %773 = vmatpush1.bf16.msra.mxu0 %v3006_v0 }
  0x35   : > { %2837 = vmatpush3.bf16.msra.mxu1 %v3007_v1 }
  0x37   : > { %360 = vadd.xlane.f32.xlu1 %v315_v40  ;;  %358 = vadd.xlane.f32.xlu0 %v314_v41  ;;  %v332_v40 = vmul.f32 %v3680_v36, %v3680_v36 }
  0x3b   : > { %364 = vadd.xlane.f32.xlu1 %v317_v45  ;;  %362 = vadd.xlane.f32.xlu0 %v316_v46 }
  0x3f   : > { %368 = vadd.xlane.f32.xlu1 %v319_v52  ;;  %366 = vadd.xlane.f32.xlu0 %v318_v53 }
  0x43   : > { %372 = vadd.xlane.f32.xlu1 %v321_v59  ;;  %370 = vadd.xlane.f32.xlu0 %v320_v60 }
  0x47   : > { %376 = vadd.xlane.f32.xlu1 %v323_v2  ;;  %374 = vadd.xlane.f32.xlu0 %v322_v3 }
  0x4b   : > { %380 = vadd.xlane.f32.xlu1 %v325_v10  ;;  %378 = vadd.xlane.f32.xlu0 %v324_v12 }
  0x4f   : > { %384 = vadd.xlane.f32.xlu1 %v327_v17  ;;  %382 = vadd.xlane.f32.xlu0 %v326_v22 }
  0x53   : > { %388 = vadd.xlane.f32.xlu1 %v329_v27  ;;  %386 = vadd.xlane.f32.xlu0 %v328_v28 }
  0x57   : > { %392 = vadd.xlane.f32.xlu1 %v331_v33  ;;  %390 = vadd.xlane.f32.xlu0 %v330_v34 }
  0x5b   : > { %396 = vadd.xlane.f32.xlu1 %v333_v37  ;;  %394 = vadd.xlane.f32.xlu0 %v332_v40  ;;  %v3692_v37 = vld [vmem:[%s4543_s1] ss:$0 sm:$0xff] }
  0xac   : > { %v335_v41 = vpop.xlane.xlu0 %334  ;;  %v339_v42 = vpop.xlane.xlu1 %338 }
  0xad   : > { %v398_v43 = vmax.f32 %v335_v41, 1e-24  ;;  %v400_v44 = vmax.f32 %v339_v42, 1e-24 }
  0xaf   : > { %3016 = vrsqrt.f32 %v398_v43 }
  0xb0   : > { %3018 = vrsqrt.f32 %v400_v44  ;;  %v337_v45 = vpop.xlane.xlu0 %336  ;;  %v341_v46 = vpop.xlane.xlu1 %340 }
  0xb1   : > { %v399_v49 = vmax.f32 %v337_v45, 1e-24  ;;  %v401_v50 = vmax.f32 %v341_v46, 1e-24 }
  0xb3   : > { %3020 = vrsqrt.f32 %v399_v49 }
  0xb4   : > { %3022 = vrsqrt.f32 %v401_v50  ;;  %v345_v51 = vpop.xlane.xlu1 %344  ;;  %v343_v52 = vpop.xlane.xlu0 %342 }
  0xb5   : > { %v403_v53 = vmax.f32 %v345_v51, 1e-24  ;;  %v402_v56 = vmax.f32 %v343_v52, 1e-24 }
  0xb7   : > { %3024 = vrsqrt.f32 %v403_v53 }
  0xb8   : > { %3026 = vrsqrt.f32 %v402_v56  ;;  %v349_v57 = vpop.xlane.xlu1 %348  ;;  %v347_v58 = vpop.xlane.xlu0 %346 }
  0xb9   : > { %v3017_v59 = vpop.eup %3016  ;;  %v405_v60 = vmax.f32 %v349_v57, 1e-24  ;;  %v404_v63 = vmax.f32 %v347_v58, 1e-24 }
  0xba   : > { %v3019_v0 = vpop.eup %3018  ;;  %v462_v1 = vmul.f32 %v3017_v59, %v3472_v6 }
  0xbb   : > { %3028 = vrsqrt.f32 %v405_v60  ;;  %v464_v2 = vmul.f32 %v3019_v0, %v3475_v7 }
  0xbc   : > { %3030 = vrsqrt.f32 %v404_v63  ;;  %v353_v3 = vpop.xlane.xlu1 %352  ;;  %v351_v10 = vpop.xlane.xlu0 %350  ;;  %v494_v34 = vmul.f32 11.313708, %v462_v1 }
  0xbd   : > { %v3021_v12 = vpop.eup %3020  ;;  %v407_v17 = vmax.f32 %v353_v3, 1e-24  ;;  %v406_v22 = vmax.f32 %v351_v10, 1e-24  ;;  %v496_v27 = vmul.f32 11.313708, %v464_v2 }
  0xbe   : > { %v3023_v28 = vpop.eup %3022  ;;  %v463_v33 = vmul.f32 %v3021_v12, %v3478_v8  ;;  %v533_v49 = vmul.f32 %v3692_v37, %v494_v34 }
  0xbf   : > { %3032 = vrsqrt.f32 %v407_v17  ;;  %v465_v6 = vmul.f32 %v3023_v28, %v3485_v11  ;;  %v535_v46 = vmul.f32 %v3692_v37, %v496_v27 }
  0xc0   : > { %3034 = vrsqrt.f32 %v406_v22  ;;  %v357_v7 = vpop.xlane.xlu1 %356  ;;  %v355_v40 = vpop.xlane.xlu0 %354  ;;  %v495_v41 = vmul.f32 11.313708, %v463_v33 }
  0xc1   : > { %v3025_v42 = vpop.eup %3024  ;;  %v409_v43 = vmax.f32 %v357_v7, 1e-24  ;;  %v408_v44 = vmax.f32 %v355_v40, 1e-24  ;;  %v497_v45 = vmul.f32 11.313708, %v465_v6 }
  0xc2   : > { %v3027_v8 = vpop.eup %3026  ;;  %v534_v50 = vmul.f32 %v3692_v37, %v495_v41  ;;  %v467_v51 = vmul.f32 %v3025_v42, %v3492_v14 }
  0xc3   : > { %3036 = vrsqrt.f32 %v409_v43  ;;  %v536_v11 = vmul.f32 %v3692_v37, %v497_v45  ;;  %v466_v52 = vmul.f32 %v3027_v8, %v3495_v15 }
  0xc4   : > { %3038 = vrsqrt.f32 %v408_v44  ;;  %v361_v53 = vpop.xlane.xlu1 %360  ;;  %v359_v56 = vpop.xlane.xlu0 %358  ;;  %v565_v57 = vpack.c.bf16 %v534_v50, %v533_v49  ;;  %v499_v58 = vmul.f32 11.313708, %v467_v51 }
  0xc5   : > { %v3029_v59 = vpop.eup %3028  ;;  %v411_v60 = vmax.f32 %v361_v53, 1e-24  ;;  %v410_v63 = vmax.f32 %v359_v56, 1e-24  ;;  %v566_v0 = vpack.c.bf16 %v536_v11, %v535_v46  ;;  %v498_v1 = vmul.f32 11.313708, %v466_v52 }
  0xc6   : > { %v3031_v2 = vpop.eup %3030  ;;  %791 = vmatmul.mubr.bf16.vlgmr.msra.gmra.mrb[0].mxu0 %v565_v57  ;;  %2838 = vmatprep.mubr.bf16.mxu1 %v565_v57  ;;  %v538_v14 = vmul.f32 %v3692_v37, %v499_v58  ;;  %v469_v3 = vmul.f32 %v3029_v59, %v3502_v18 }
  0xc7   : > { %3040 = vrsqrt.f32 %v411_v60  ;;  %2839 = vmatmul.mubr.bf16.vlgmr.msra.gmra.mrb[0].mxu1 %v566_v0  ;;  %800 = vmatprep.mubr.bf16.mxu0 %v3352_v9  ;;  %v537_v15 = vmul.f32 %v3692_v37, %v498_v1  ;;  %v468_v10 = vmul.f32 %v3031_v2, %v3505_v19 }
  0xc8   : > { %3042 = vrsqrt.f32 %v410_v63  ;;  %v365_v12 = vpop.xlane.xlu1 %364  ;;  %v363_v17 = vpop.xlane.xlu0 %362  ;;  %v501_v22 = vmul.f32 11.313708, %v469_v3 }
  0xc9   : > { %v3033_v27 = vpop.eup %3032  ;;  %v413_v28 = vmax.f32 %v365_v12, 1e-24  ;;  %v412_v33 = vmax.f32 %v363_v17, 1e-24  ;;  %v567_v34 = vpack.c.bf16 %v538_v14, %v537_v15  ;;  %v500_v6 = vmul.f32 11.313708, %v468_v10 }
  0xca   : > { %v3035_v7 = vpop.eup %3034  ;;  %v540_v18 = vmul.f32 %v3692_v37, %v501_v22  ;;  %v471_v40 = vmul.f32 %v3033_v27, %v3508_v20 }
  0xcb   : > { %3044 = vrsqrt.f32 %v413_v28  ;;  %2842 = vmatprep.mubr.bf16.mxu1 %v567_v34  ;;  %v539_v41 = vmul.f32 %v3692_v37, %v500_v6  ;;  %v470_v19 = vmul.f32 %v3035_v7, %v3511_v21 }
  0xcc   : > { %3046 = vrsqrt.f32 %v412_v33  ;;  %v369_v42 = vpop.xlane.xlu1 %368  ;;  %v367_v43 = vpop.xlane.xlu0 %366  ;;  %v503_v44 = vmul.f32 11.313708, %v471_v40 }
  0xcd   : > { %v3037_v45 = vpop.eup %3036  ;;  %v415_v46 = vmax.f32 %v369_v42, 1e-24  ;;  %v414_v8 = vmax.f32 %v367_v43, 1e-24  ;;  %v3710_v49 = vpack.c.bf16 %v540_v18, %v539_v41  ;;  %v502_v50 = vmul.f32 11.313708, %v470_v19 }
  0xce   : > { %v3039_v51 = vpop.eup %3038  ;;  %801 = vmatmul.mubr.bf16.gmra.mrb[4].mxu0 %v566_v0  ;;  %v542_v20 = vmul.f32 %v3692_v37, %v503_v44  ;;  %v473_v11 = vmul.f32 %v3037_v45, %v3518_v24 }
  0xcf   : > { %3048 = vrsqrt.f32 %v415_v46  ;;  %2843 = vmatmul.mubr.bf16.gmra.mrb[4].mxu1 %v3710_v49  ;;  %810 = vmatprep.mubr.bf16.mxu0 %v3352_v9  ;;  %v541_v21 = vmul.f32 %v3692_v37, %v502_v50  ;;  %v472_v52 = vmul.f32 %v3039_v51, %v3521_v25 }
  0xd0   : > { %3050 = vrsqrt.f32 %v414_v8  ;;  %v373_v53 = vpop.xlane.xlu1 %372  ;;  %v371_v56 = vpop.xlane.xlu0 %370  ;;  %v505_v57 = vmul.f32 11.313708, %v473_v11 }
  0xd1   : > { %v3041_v58 = vpop.eup %3040  ;;  %v417_v59 = vmax.f32 %v373_v53, 1e-24  ;;  %v416_v60 = vmax.f32 %v371_v56, 1e-24  ;;  %v3718_v63 = vpack.c.bf16 %v542_v20, %v541_v21  ;;  %v504_v0 = vmul.f32 11.313708, %v472_v52 }
  0xd2   : > { %v3043_v24 = vpop.eup %3042  ;;  %v544_v1 = vmul.f32 %v3692_v37, %v505_v57  ;;  %v475_v2 = vmul.f32 %v3041_v58, %v3537_v31 }
  0xd3   : > { %3052 = vrsqrt.f32 %v417_v59  ;;  %2846 = vmatprep.mubr.bf16.mxu1 %v3718_v63  ;;  %v543_v25 = vmul.f32 %v3692_v37, %v504_v0  ;;  %v474_v14 = vmul.f32 %v3043_v24, %v3540_v32 }
  0xd4   : > { %3054 = vrsqrt.f32 %v416_v60  ;;  %v377_v3 = vpop.xlane.xlu1 %376  ;;  %v375_v15 = vpop.xlane.xlu0 %374  ;;  %v507_v10 = vmul.f32 11.313708, %v475_v2 }
  0xd5   : > { %v3045_v12 = vpop.eup %3044  ;;  %v419_v17 = vmax.f32 %v377_v3, 1e-24  ;;  %v418_v22 = vmax.f32 %v375_v15, 1e-24  ;;  %v3725_v27 = vpack.c.bf16 %v544_v1, %v543_v25  ;;  %v506_v28 = vmul.f32 11.313708, %v474_v14 }
  0xd6   : > { %v3047_v33 = vpop.eup %3046  ;;  %811 = vmatmul.mubr.bf16.gmra.mrb[8].mxu0 %v567_v34  ;;  %v546_v31 = vmul.f32 %v3692_v37, %v507_v10  ;;  %v477_v6 = vmul.f32 %v3045_v12, %v3556_v38 }
  0xd7   : > { %3056 = vrsqrt.f32 %v419_v17  ;;  %2847 = vmatmul.mubr.bf16.gmra.mrb[8].mxu1 %v3725_v27  ;;  %820 = vmatprep.mubr.bf16.mxu0 %v3352_v9  ;;  %v545_v32 = vmul.f32 %v3692_v37, %v506_v28  ;;  %v476_v7 = vmul.f32 %v3047_v33, %v3559_v39 }
  0xd8   : > { %3058 = vrsqrt.f32 %v418_v22  ;;  %v381_v18 = vpop.xlane.xlu1 %380  ;;  %v379_v40 = vpop.xlane.xlu0 %378  ;;  %v509_v41 = vmul.f32 11.313708, %v477_v6 }
  0xd9   : > { %v3049_v19 = vpop.eup %3048  ;;  %v421_v42 = vmax.f32 %v381_v18, 1e-24  ;;  %v420_v34 = vmax.f32 %v379_v40, 1e-24  ;;  %v3733_v43 = vpack.c.bf16 %v546_v31, %v545_v32  ;;  %v508_v44 = vmul.f32 11.313708, %v476_v7 }
  0xda   : > { %v3051_v38 = vpop.eup %3050  ;;  %v548_v45 = vmul.f32 %v3692_v37, %v509_v41  ;;  %v479_v46 = vmul.f32 %v3049_v19, %v3579_v47 }
  0xdb   : > { %3060 = vrsqrt.f32 %v421_v42  ;;  %2850 = vmatprep.mubr.bf16.mxu1 %v3733_v43  ;;  %v547_v39 = vmul.f32 %v3692_v37, %v508_v44  ;;  %v478_v8 = vmul.f32 %v3051_v38, %v3582_v48 }
  0xdc   : > { %3062 = vrsqrt.f32 %v420_v34  ;;  %v385_v50 = vpop.xlane.xlu1 %384  ;;  %v383_v51 = vpop.xlane.xlu0 %382  ;;  %v511_v20 = vmul.f32 11.313708, %v479_v46 }
  0xdd   : > { %v3053_v11 = vpop.eup %3052  ;;  %v423_v21 = vmax.f32 %v385_v50, 1e-24  ;;  %v422_v52 = vmax.f32 %v383_v51, 1e-24  ;;  %v3740_v53 = vpack.c.bf16 %v548_v45, %v547_v39  ;;  %v510_v56 = vmul.f32 11.313708, %v478_v8 }
  0xde   : > { %v3055_v57 = vpop.eup %3054  ;;  %821 = vmatmul.mubr.bf16.gmra.mrb[12].mxu0 %v3710_v49  ;;  %v550_v47 = vmul.f32 %v3692_v37, %v511_v20  ;;  %v481_v58 = vmul.f32 %v3053_v11, %v3598_v54 }
  0xdf   : > { %3064 = vrsqrt.f32 %v423_v21  ;;  %2851 = vmatmul.mubr.bf16.gmra.mrb[12].mxu1 %v3740_v53  ;;  %830 = vmatprep.mubr.bf16.mxu0 %v3352_v9  ;;  %v549_v48 = vmul.f32 %v3692_v37, %v510_v56  ;;  %v480_v59 = vmul.f32 %v3055_v57, %v3601_v55 }
  0xe0   : > { %3066 = vrsqrt.f32 %v422_v52  ;;  %v389_v60 = vpop.xlane.xlu1 %388  ;;  %v387_v0 = vpop.xlane.xlu0 %386  ;;  %v513_v24 = vmul.f32 11.313708, %v481_v58 }
  0xe1   : > { %v3057_v1 = vpop.eup %3056  ;;  %v425_v2 = vmax.f32 %v389_v60, 1e-24  ;;  %v424_v49 = vmax.f32 %v387_v0, 1e-24  ;;  %v3749_v25 = vpack.c.bf16 %v550_v47, %v549_v48  ;;  %v512_v14 = vmul.f32 11.313708, %v480_v59 }
  0xe2   : > { %v3059_v54 = vpop.eup %3058  ;;  %v552_v3 = vmul.f32 %v3692_v37, %v513_v24  ;;  %v483_v15 = vmul.f32 %v3057_v1, %v3617_v61 }
  0xe3   : > { %3068 = vrsqrt.f32 %v425_v2  ;;  %2854 = vmatprep.mubr.bf16.mxu1 %v3749_v25  ;;  %v551_v55 = vmul.f32 %v3692_v37, %v512_v14  ;;  %v482_v10 = vmul.f32 %v3059_v54, %v3620_v62 }
  0xe4   : > { %3070 = vrsqrt.f32 %v424_v49  ;;  %v393_v12 = vpop.xlane.xlu1 %392  ;;  %v391_v17 = vpop.xlane.xlu0 %390  ;;  %v515_v22 = vmul.f32 11.313708, %v483_v15 }
  0xe5   : > { %v3061_v28 = vpop.eup %3060  ;;  %v427_v33 = vmax.f32 %v393_v12, 1e-24  ;;  %v426_v31 = vmax.f32 %v391_v17, 1e-24  ;;  %v3756_v6 = vpack.c.bf16 %v552_v3, %v551_v55  ;;  %v514_v32 = vmul.f32 11.313708, %v482_v10 }
  0xe6   : > { %v3063_v7 = vpop.eup %3062  ;;  %831 = vmatmul.mubr.bf16.gmra.mrb[16].mxu0 %v3718_v63  ;;  %v554_v61 = vmul.f32 %v3692_v37, %v515_v22  ;;  %v485_v18 = vmul.f32 %v3061_v28, %v3636_v4 }
  0xe7   : > { %3072 = vrsqrt.f32 %v427_v33  ;;  %2855 = vmatmul.mubr.bf16.gmra.mrb[16].mxu1 %v3756_v6  ;;  %840 = vmatprep.mubr.bf16.mxu0 %v3352_v9  ;;  %v553_v62 = vmul.f32 %v3692_v37, %v514_v32  ;;  %v484_v40 = vmul.f32 %v3063_v7, %v3639_v5 }
  0xe8   : > { %3074 = vrsqrt.f32 %v426_v31  ;;  %v397_v41 = vpop.xlane.xlu1 %396  ;;  %v395_v19 = vpop.xlane.xlu0 %394  ;;  %v517_v42 = vmul.f32 11.313708, %v485_v18 }
  0xe9   : > { %v3065_v34 = vpop.eup %3064  ;;  %v429_v44 = vmax.f32 %v397_v41, 1e-24  ;;  %v428_v63 = vmax.f32 %v395_v19, 1e-24  ;;  %v575_v38 = vpack.c.bf16 %v554_v61, %v553_v62  ;;  %v516_v45 = vmul.f32 11.313708, %v484_v40 }
  0xea   : > { %v3067_v46 = vpop.eup %3066  ;;  %v556_v4 = vmul.f32 %v3692_v37, %v517_v42  ;;  %v487_v39 = vmul.f32 %v3065_v34, %v3647_v13 }
  0xeb   : > { %3076 = vrsqrt.f32 %v429_v44  ;;  %2858 = vmatprep.mubr.bf16.mxu1 %v575_v38  ;;  %v555_v8 = vmul.f32 %v3692_v37, %v516_v45  ;;  %v486_v5 = vmul.f32 %v3067_v46, %v3650_v16 }
  0xec   : > { %3078 = vrsqrt.f32 %v428_v63  ;;  %v519_v50 = vmul.f32 11.313708, %v487_v39 }
  0xed   : > { %v3069_v51 = vpop.eup %3068  ;;  %v576_v20 = vpack.c.bf16 %v556_v4, %v555_v8  ;;  %v518_v11 = vmul.f32 11.313708, %v486_v5 }
  0xee   : > { %v3071_v21 = vpop.eup %3070  ;;  %841 = vmatmul.mubr.bf16.gmra.mrb[20].mxu0 %v3725_v27  ;;  %v558_v52 = vmul.f32 %v3692_v37, %v519_v50  ;;  %v489_v56 = vmul.f32 %v3069_v51, %v3657_v23 }
  0xef   : > { %2859 = vmatmul.mubr.bf16.gmra.mrb[20].mxu1 %v576_v20  ;;  %850 = vmatprep.mubr.bf16.mxu0 %v3352_v9  ;;  %v557_v13 = vmul.f32 %v3692_v37, %v518_v11  ;;  %v488_v57 = vmul.f32 %v3071_v21, %v3660_v26 }
  0xf0   : > { %v521_v16 = vmul.f32 11.313708, %v489_v56 }
  0xf1   : > { %v3073_v47 = vpop.eup %3072  ;;  %v577_v58 = vpack.c.bf16 %v558_v52, %v557_v13  ;;  %v520_v48 = vmul.f32 11.313708, %v488_v57 }
  0xf2   : > { %v3075_v59 = vpop.eup %3074  ;;  %v560_v60 = vmul.f32 %v3692_v37, %v521_v16  ;;  %v491_v27 = vmul.f32 %v3073_v47, %v3667_v29 }
  0xf3   : > { %2862 = vmatprep.mubr.bf16.mxu1 %v577_v58  ;;  %v559_v0 = vmul.f32 %v3692_v37, %v520_v48  ;;  %v490_v23 = vmul.f32 %v3075_v59, %v3670_v30 }
  0xf4   : > { %v523_v24 = vmul.f32 11.313708, %v491_v27 }
  0xf5   : > { %v3077_v1 = vpop.eup %3076  ;;  %v578_v2 = vpack.c.bf16 %v560_v60, %v559_v0  ;;  %v522_v49 = vmul.f32 11.313708, %v490_v23 }
  0xf6   : > { %v3079_v14 = vpop.eup %3078  ;;  %851 = vmatmul.mubr.bf16.gmra.mrb[24].mxu0 %v3733_v43  ;;  %v562_v26 = vmul.f32 %v3692_v37, %v523_v24  ;;  %v493_v54 = vmul.f32 %v3077_v1, %v3677_v35  ;;  %v615_v35 = vlaneseq }
  0xf7   : > { %2863 = vmatmul.mubr.bf16.gmra.mrb[24].mxu1 %v578_v2  ;;  %860 = vmatprep.mubr.bf16.mxu0 %v3352_v9  ;;  %v561_v29 = vmul.f32 %v3692_v37, %v522_v49  ;;  %v492_v3 = vmul.f32 %v3079_v14, %v3680_v36 }
  0xf8   : > { %v525_v15 = vmul.f32 11.313708, %v493_v54  ;;  %v616_v36 = vshrl.u32 %v615_v35, 7 }
  0xf9   : > { %v579_v30 = vpack.c.bf16 %v562_v26, %v561_v29  ;;  %v524_v55 = vmul.f32 11.313708, %v492_v3 }
  0xfa   : > { %v564_v10 = vmul.f32 %v3692_v37, %v525_v15  ;;  %v621_v17 = vsub.s32 1, %v616_v36 }
  0xfb   : > { %2866 = vmatprep.mubr.bf16.mxu1 %v579_v30  ;;  %v563_v12 = vmul.f32 %v3692_v37, %v524_v55  ;;  %v617_v37 = vsub.s32 0, %v616_v36 }
  0xfd   : > { %v580_v43 = vpack.c.bf16 %v564_v10, %v563_v12 }
  0xfe   : > { %861 = vmatmul.mubr.bf16.gmra.mrb[28].mxu0 %v3740_v53  ;;  %v613_v53 = vld [vmem:[%s4545_s3] sm:$0x7] }
  0xff   : > { %2867 = vmatmul.mubr.bf16.gmra.mrb[28].mxu1 %v580_v43  ;;  %870 = vmatprep.mubr.bf16.mxu0 %v3352_v9  ;;  %v3801_v22 = vrot.slane %v613_v53, %v617_v37  ;;  %v3805_v31 = vrot.slane %v613_v53, %v621_v17 }
 0x106   : > { %871 = vmatmul.mubr.bf16.gmra.mrb[32].mxu0 %v3749_v25  ;;  %v625_v25 = vsub.s32 2, %v616_v36 }
 0x107   : > { %880 = vmatprep.mubr.bf16.mxu0 %v3352_v9 }
 0x108   : > { %v3803_v28 = vrot.slane %v613_v53, %v625_v25 }
 0x10e   : > { %881 = vmatmul.mubr.bf16.gmra.mrb[36].mxu0 %v3756_v6 }
 0x10f   : > { %890 = vmatprep.mubr.bf16.mxu0 %v3352_v9 }
 0x116   : > { %891 = vmatmul.mubr.bf16.gmra.mrb[40].mxu0 %v575_v38 }
 0x117   : > { %900 = vmatprep.mubr.bf16.mxu0 %v3352_v9 }
 0x11e   : > { %901 = vmatmul.mubr.bf16.gmra.mrb[44].mxu0 %v576_v20 }
 0x11f   : > { %910 = vmatprep.mubr.bf16.mxu0 %v3352_v9 }
 0x126   : > { %911 = vmatmul.mubr.bf16.gmra.mrb[48].mxu0 %v577_v58 }
 0x127   : > { %920 = vmatprep.mubr.bf16.mxu0 %v3352_v9 }
 0x12e   : > { %921 = vmatmul.mubr.bf16.gmra.mrb[52].mxu0 %v578_v2 }
 0x12f   : > { %930 = vmatprep.mubr.bf16.mxu0 %v3352_v9 }
 0x136   : > { %931 = vmatmul.mubr.bf16.gmra.mrb[56].mxu0 %v579_v30 }
 0x137   : > { %940 = vmatprep.mubr.bf16.mxu0 %v3352_v9 }
 0x13e   : > { %941 = vmatmul.mubr.bf16.gmra.mrb[60].mxu0 %v580_v43 }
 0x199   : > { %v792_v33 = vpop.f32.mrb[0].mxu0 }
 0x19a   : > { %v793_v6 = vadd.f32 %v792_v33, %v3801_v22  ;;  %v794_v9 = vpop.f32.mrb[1].mxu0  ;;  %v2840_v32 = vpop.f32.mrb[0].mxu1 }
 0x19b   : > { %v3809_v7 = vadd.f32 %v2840_v32, %v3803_v28  ;;  %v796_v61 = vpop.f32.mrb[2].mxu0  ;;  %v985_v18 = vpop.f32.mrb[1].mxu1  ;;  %v3816_v42 = vadd.f32 %v794_v9, %v3805_v31 }
 0x19c   : > { %v797_v62 = vadd.f32 %v796_v61, %v3801_v22  ;;  %v3813_v40 = vadd.f32 %v985_v18, %v3803_v28  ;;  %v798_v41 = vpop.f32.mrb[3].mxu0  ;;  %v2841_v19 = vpop.f32.mrb[2].mxu1  ;;  %v1112_v38 = vmul.f32 0.088388346, %v793_v6 }
 0x19d   : > { %v3819_v34 = vadd.f32 %v798_v41, %v3805_v31  ;;  %v3822_v44 = vadd.f32 %v2841_v19, %v3803_v28  ;;  %v988_v63 = vpop.f32.mrb[3].mxu1 }
 0x19e   : > { %v1113_v45 = vmul.f32 0.088388346, %v797_v62  ;;  %v3825_v46 = vadd.f32 %v988_v63, %v3803_v28 }
 0x19f   : > { %v1176_v4 = vpack.c.bf16 %v3819_v34, %v3816_v42  ;;  %v1209_v39 = vpack.c.bf16 %v3822_v44, %v3809_v7 }
 0x1a0   : > { %v3831_v8 = vpack.c.bf16 %v1113_v45, %v1112_v38  ;;  %v1208_v5 = vpack.c.bf16 %v3825_v46, %v3813_v40 }
 0x1a1   : > { %v802_v50 = vpop.f32.mrb[4].mxu0 }
 0x1a2   : > { %v803_v51 = vadd.f32 %v802_v50, %v3801_v22  ;;  %v804_v20 = vpop.f32.mrb[5].mxu0  ;;  %2654 = vmatprep.mubr.bf16.mxu1 %v3831_v8  ;;  %v2844_v11 = vpop.f32.mrb[4].mxu1 }
 0x1a3   : > { %v806_v21 = vpop.f32.mrb[6].mxu0  ;;  %v3838_v52 = vadd.f32 %v2844_v11, %v3803_v28  ;;  %v1001_v56 = vpop.f32.mrb[5].mxu1  ;;  %v3845_v58 = vadd.f32 %v804_v20, %v3805_v31 }
 0x1a4   : > { %v807_v13 = vadd.f32 %v806_v21, %v3801_v22  ;;  %v808_v57 = vpop.f32.mrb[7].mxu0  ;;  %v3842_v16 = vadd.f32 %v1001_v56, %v3803_v28  ;;  %v2845_v47 = vpop.f32.mrb[6].mxu1  ;;  %v1114_v27 = vmul.f32 0.088388346, %v803_v51 }
 0x1a5   : > { %v3848_v48 = vadd.f32 %v808_v57, %v3805_v31  ;;  %v3851_v59 = vadd.f32 %v2845_v47, %v3803_v28  ;;  %v1004_v60 = vpop.f32.mrb[7].mxu1 }
 0x1a6   : > { %v1115_v0 = vmul.f32 0.088388346, %v807_v13  ;;  %v3854_v23 = vadd.f32 %v1004_v60, %v3803_v28 }
 0x1a7   : > { %v1177_v24 = vpack.c.bf16 %v3848_v48, %v3845_v58  ;;  %v1211_v1 = vpack.c.bf16 %v3851_v59, %v3838_v52 }
 0x1a8   : > { %v3860_v2 = vpack.c.bf16 %v1115_v0, %v1114_v27  ;;  %v1210_v49 = vpack.c.bf16 %v3854_v23, %v3842_v16 }
 0x1a9   : > { %v812_v14 = vpop.f32.mrb[8].mxu0 }
 0x1aa   : > { %v813_v26 = vadd.f32 %v812_v14, %v3801_v22  ;;  %v814_v54 = vpop.f32.mrb[9].mxu0  ;;  %v2848_v29 = vpop.f32.mrb[8].mxu1 }
 0x1ab   : > { %v816_v3 = vpop.f32.mrb[10].mxu0  ;;  %v3866_v15 = vadd.f32 %v2848_v29, %v3803_v28  ;;  %v1017_v30 = vpop.f32.mrb[9].mxu1  ;;  %v3873_v35 = vadd.f32 %v814_v54, %v3805_v31 }
 0x1ac   : > { %v817_v55 = vadd.f32 %v816_v3, %v3801_v22  ;;  %v818_v10 = vpop.f32.mrb[11].mxu0  ;;  %v3870_v12 = vadd.f32 %v1017_v30, %v3803_v28  ;;  %v2849_v43 = vpop.f32.mrb[10].mxu1  ;;  %v1116_v25 = vmul.f32 0.088388346, %v813_v26 }
 0x1ad   : > { %v3876_v36 = vadd.f32 %v818_v10, %v3805_v31  ;;  %v3879_v37 = vadd.f32 %v2849_v43, %v3803_v28  ;;  %v1020_v53 = vpop.f32.mrb[11].mxu1 }
 0x1ae   : > { %v1117_v17 = vmul.f32 0.088388346, %v817_v55  ;;  %v3882_v33 = vadd.f32 %v1020_v53, %v3803_v28 }
 0x1af   : > { %v1178_v6 = vpack.c.bf16 %v3876_v36, %v3873_v35  ;;  %v1213_v9 = vpack.c.bf16 %v3879_v37, %v3866_v15 }
 0x1b0   : > { %v3888_v32 = vpack.c.bf16 %v1117_v17, %v1116_v25  ;;  %v1212_v61 = vpack.c.bf16 %v3882_v33, %v3870_v12 }
 0x1b1   : > { %v822_v18 = vpop.f32.mrb[12].mxu0 }
 0x1b2   : > { %v823_v62 = vadd.f32 %v822_v18, %v3801_v22  ;;  %v824_v41 = vpop.f32.mrb[13].mxu0  ;;  %v2852_v19 = vpop.f32.mrb[12].mxu1 }
 0x1b3   : > { %v826_v63 = vpop.f32.mrb[14].mxu0  ;;  %v3894_v38 = vadd.f32 %v2852_v19, %v3803_v28  ;;  %v1033_v45 = vpop.f32.mrb[13].mxu1  ;;  %v3901_v21 = vadd.f32 %v824_v41, %v3805_v31 }
 0x1b4   : > { %v827_v50 = vadd.f32 %v826_v63, %v3801_v22  ;;  %v828_v51 = vpop.f32.mrb[15].mxu0  ;;  %v3898_v20 = vadd.f32 %v1033_v45, %v3803_v28  ;;  %v2853_v11 = vpop.f32.mrb[14].mxu1  ;;  %v1118_v47 = vmul.f32 0.088388346, %v823_v62 }
 0x1b5   : > { %v3904_v56 = vadd.f32 %v828_v51, %v3805_v31  ;;  %v3907_v13 = vadd.f32 %v2853_v11, %v3803_v28  ;;  %v1036_v57 = vpop.f32.mrb[15].mxu1 }
 0x1b6   : > { %v1119_v60 = vmul.f32 0.088388346, %v827_v50  ;;  %v3910_v27 = vadd.f32 %v1036_v57, %v3803_v28 }
 0x1b7   : > { %v1179_v0 = vpack.c.bf16 %v3904_v56, %v3901_v21  ;;  %v1215_v14 = vpack.c.bf16 %v3907_v13, %v3894_v38 }
 0x1b8   : > { %v3916_v26 = vpack.c.bf16 %v1119_v60, %v1118_v47  ;;  %v1214_v54 = vpack.c.bf16 %v3910_v27, %v3898_v20 }
 0x1b9   : > { %v832_v29 = vpop.f32.mrb[16].mxu0 }
 0x1ba   : > { %v833_v3 = vadd.f32 %v832_v29, %v3801_v22  ;;  %v834_v30 = vpop.f32.mrb[17].mxu0  ;;  %v2856_v55 = vpop.f32.mrb[16].mxu1 }
 0x1bb   : > { %v1058_v10 = vadd.f32 %v2856_v55, %v3803_v28  ;;  %v836_v43 = vpop.f32.mrb[18].mxu0  ;;  %v1049_v53 = vpop.f32.mrb[17].mxu1  ;;  %v3925_v41 = vadd.f32 %v834_v30, %v3805_v31 }
 0x1bc   : > { %v837_v25 = vadd.f32 %v836_v43, %v3801_v22  ;;  %v1050_v17 = vadd.f32 %v1049_v53, %v3803_v28  ;;  %v838_v18 = vpop.f32.mrb[19].mxu0  ;;  %v2857_v62 = vpop.f32.mrb[18].mxu1  ;;  %v1120_v50 = vmul.f32 0.088388346, %v833_v3 }
 0x1bd   : > { %v3928_v19 = vadd.f32 %v838_v18, %v3805_v31  ;;  %v1061_v63 = vadd.f32 %v2857_v62, %v3803_v28  ;;  %v1052_v45 = vpop.f32.mrb[19].mxu1 }
 0x1be   : > { %v1121_v51 = vmul.f32 0.088388346, %v837_v25  ;;  %v1053_v11 = vadd.f32 %v1052_v45, %v3803_v28 }
 0x1bf   : > { %v1180_v57 = vpack.c.bf16 %v3928_v19, %v3925_v41  ;;  %v1217_v47 = vpack.c.bf16 %v1061_v63, %v1058_v10 }
 0x1c0   : > { %v3934_v60 = vpack.c.bf16 %v1121_v51, %v1120_v50  ;;  %v1216_v29 = vpack.c.bf16 %v1053_v11, %v1050_v17 }
 0x1c1   : > { %v842_v55 = vpop.f32.mrb[20].mxu0 }
 0x1c2   : > { %v843_v30 = vadd.f32 %v842_v55, %v3801_v22  ;;  %v844_v43 = vpop.f32.mrb[21].mxu0  ;;  %v2860_v53 = vpop.f32.mrb[20].mxu1  ;;  %2686 = vmatprep.subr.bf16.mxu0 %v1216_v29 }
 0x1c3   : > { %v1074_v18 = vadd.f32 %v2860_v53, %v3803_v28  ;;  %v846_v62 = vpop.f32.mrb[22].mxu0  ;;  %v1065_v3 = vpop.f32.mrb[21].mxu1  ;;  %2687 = vmatpush3.bf16.msra.mxu0 %v1208_v5  ;;  %v3944_v45 = vadd.f32 %v844_v43, %v3805_v31 }
 0x1c4   : > { %v847_v25 = vadd.f32 %v846_v62, %v3801_v22  ;;  %v1066_v10 = vadd.f32 %v1065_v3, %v3803_v28  ;;  %v848_v63 = vpop.f32.mrb[23].mxu0  ;;  %v2861_v17 = vpop.f32.mrb[22].mxu1  ;;  %2688 = vmatprep.subr.bf16.mxu0 %v1217_v47  ;;  %v1122_v29 = vmul.f32 0.088388346, %v843_v30 }
 0x1c5   : > { %v3947_v50 = vadd.f32 %v848_v63, %v3805_v31  ;;  %v1077_v51 = vadd.f32 %v2861_v17, %v3803_v28  ;;  %v1068_v11 = vpop.f32.mrb[23].mxu1 }
 0x1c6   : > { %v1123_v55 = vmul.f32 0.088388346, %v847_v25  ;;  %v1069_v40 = vadd.f32 %v1068_v11, %v3803_v28 }
 0x1c7   : > { %v1181_v46 = vpack.c.bf16 %v3947_v50, %v3944_v45  ;;  %v1219_v5 = vpack.c.bf16 %v1077_v51, %v1074_v18  ;;  %2689 = vmatpush3.bf16.msra.mxu0 %v1209_v39 }
 0x1c8   : > { %v3956_v47 = vpack.c.bf16 %v1123_v55, %v1122_v29  ;;  %v1218_v43 = vpack.c.bf16 %v1069_v40, %v1066_v10 }
 0x1c9   : > { %v852_v53 = vpop.f32.mrb[24].mxu0 }
 0x1ca   : > { %v853_v62 = vadd.f32 %v852_v53, %v3801_v22  ;;  %v854_v3 = vpop.f32.mrb[25].mxu0  ;;  %v2864_v63 = vpop.f32.mrb[24].mxu1  ;;  %2690 = vmatprep.subr.bf16.mxu0 %v1218_v43 }
 0x1cb   : > { %v1090_v30 = vadd.f32 %v2864_v63, %v3803_v28  ;;  %v856_v25 = vpop.f32.mrb[26].mxu0  ;;  %v1081_v17 = vpop.f32.mrb[25].mxu1  ;;  %2691 = vmatpush3.bf16.msra.mxu0 %v1210_v49  ;;  %v3966_v10 = vadd.f32 %v854_v3, %v3805_v31 }
 0x1cc   : > { %v857_v7 = vadd.f32 %v856_v25, %v3801_v22  ;;  %v1082_v44 = vadd.f32 %v1081_v17, %v3803_v28  ;;  %v858_v39 = vpop.f32.mrb[27].mxu0  ;;  %v2865_v18 = vpop.f32.mrb[26].mxu1  ;;  %2692 = vmatprep.subr.bf16.mxu0 %v1219_v5  ;;  %v1124_v55 = vmul.f32 0.088388346, %v853_v62 }
 0x1cd   : > { %v3969_v51 = vadd.f32 %v858_v39, %v3805_v31  ;;  %v1093_v11 = vadd.f32 %v2865_v18, %v3803_v28  ;;  %v1084_v29 = vpop.f32.mrb[27].mxu1 }
 0x1ce   : > { %v1125_v40 = vmul.f32 0.088388346, %v857_v7  ;;  %v1085_v16 = vadd.f32 %v1084_v29, %v3803_v28 }
 0x1cf   : > { %v1182_v23 = vpack.c.bf16 %v3969_v51, %v3966_v10  ;;  %v1221_v49 = vpack.c.bf16 %v1093_v11, %v1090_v30  ;;  %2693 = vmatpush3.bf16.msra.mxu0 %v1211_v1 }
 0x1d0   : > { %v3978_v5 = vpack.c.bf16 %v1125_v40, %v1124_v55  ;;  %v1220_v43 = vpack.c.bf16 %v1085_v16, %v1082_v44 }
 0x1d1   : > { %v862_v53 = vpop.f32.mrb[28].mxu0 }
 0x1d2   : > { %v863_v3 = vadd.f32 %v862_v53, %v3801_v22  ;;  %v864_v63 = vpop.f32.mrb[29].mxu0  ;;  %v2868_v25 = vpop.f32.mrb[28].mxu1  ;;  %2694 = vmatprep.subr.bf16.mxu0 %v1220_v43 }
 0x1d3   : > { %v1106_v62 = vadd.f32 %v2868_v25, %v3803_v28  ;;  %v866_v17 = vpop.f32.mrb[30].mxu0  ;;  %v1097_v7 = vpop.f32.mrb[29].mxu1  ;;  %2695 = vmatpush3.bf16.msra.mxu0 %v1212_v61  ;;  %v3988_v44 = vadd.f32 %v864_v63, %v3805_v31 }
 0x1d4   : > { %v867_v52 = vadd.f32 %v866_v17, %v3801_v22  ;;  %v1098_v59 = vadd.f32 %v1097_v7, %v3803_v28  ;;  %v868_v1 = vpop.f32.mrb[31].mxu0  ;;  %v2869_v30 = vpop.f32.mrb[30].mxu1  ;;  %2696 = vmatprep.subr.bf16.mxu0 %v1221_v49  ;;  %v1126_v29 = vmul.f32 0.088388346, %v863_v3 }
 0x1d5   : > { %v3991_v39 = vadd.f32 %v868_v1, %v3805_v31  ;;  %v1109_v18 = vadd.f32 %v2869_v30, %v3803_v28  ;;  %v1100_v11 = vpop.f32.mrb[31].mxu1 }
 0x1d6   : > { %v1127_v55 = vmul.f32 0.088388346, %v867_v52  ;;  %v1101_v12 = vadd.f32 %v1100_v11, %v3803_v28 }
 0x1d7   : > { %v1183_v33 = vpack.c.bf16 %v3991_v39, %v3988_v44  ;;  %v1223_v61 = vpack.c.bf16 %v1109_v18, %v1106_v62  ;;  %2697 = vmatpush3.bf16.msra.mxu0 %v1213_v9 }
 0x1d8   : > { %v4000_v40 = vpack.c.bf16 %v1127_v55, %v1126_v29  ;;  %v1222_v16 = vpack.c.bf16 %v1101_v12, %v1098_v59 }
 0x1d9   : > { %v872_v49 = vpop.f32.mrb[32].mxu0 }
 0x1da   : > { %v873_v43 = vadd.f32 %v872_v49, %v3801_v22  ;;  %v874_v53 = vpop.f32.mrb[33].mxu0  ;;  %2698 = vmatprep.subr.bf16.mxu0 %v1222_v16 }
 0x1db   : > { %v876_v3 = vpop.f32.mrb[34].mxu0  ;;  %2699 = vmatpush3.bf16.msra.mxu0 %v1214_v54  ;;  %v875_v15 = vadd.f32 %v874_v53, %v3805_v31 }
 0x1dc   : > { %v877_v28 = vadd.f32 %v876_v3, %v3801_v22  ;;  %v878_v63 = vpop.f32.mrb[35].mxu0  ;;  %2700 = vmatprep.subr.bf16.mxu0 %v1223_v61  ;;  %v1128_v9 = vmul.f32 0.088388346, %v873_v43 }
 0x1dd   : > { %v879_v37 = vadd.f32 %v878_v63, %v3805_v31 }
 0x1de   : > { %v1129_v25 = vmul.f32 0.088388346, %v877_v28 }
 0x1df   : > { %v1184_v62 = vpack.c.bf16 %v879_v37, %v875_v15  ;;  %2701 = vmatpush3.bf16.msra.mxu0 %v1215_v14 }
 0x1e0   : > { %v4012_v17 = vpack.c.bf16 %v1129_v25, %v1128_v9 }
 0x1e1   : > { %v882_v7 = vpop.f32.mrb[36].mxu0  ;;  %2638 = vmatprep.subr.bf16.mxu1 %v1184_v62 }
 0x1e2   : > { %v883_v20 = vadd.f32 %v882_v7, %v3801_v22  ;;  %v884_v27 = vpop.f32.mrb[37].mxu0  ;;  %2639 = vmatpush3.bf16.xpose.msra.mxu1 %v1176_v4 }
 0x1e3   : > { %v886_v54 = vpop.f32.mrb[38].mxu0  ;;  %v885_v1 = vadd.f32 %v884_v27, %v3805_v31 }
 0x1e4   : > { %v887_v52 = vadd.f32 %v886_v54, %v3801_v22  ;;  %v888_v59 = vpop.f32.mrb[39].mxu0  ;;  %v1130_v13 = vmul.f32 0.088388346, %v883_v20 }
 0x1e5   : > { %v889_v38 = vadd.f32 %v888_v59, %v3805_v31 }
 0x1e6   : > { %v1131_v14 = vmul.f32 0.088388346, %v887_v52 }
 0x1e7   : > { %v1185_v30 = vpack.c.bf16 %v889_v38, %v885_v1 }
 0x1e8   : > { %v4021_v18 = vpack.c.bf16 %v1131_v14, %v1130_v13 }
 0x1e9   : > { %v892_v11 = vpop.f32.mrb[40].mxu0  ;;  %2640 = vmatprep.subr.bf16.mxu1 %v1185_v30 }
 0x1ea   : > { %v893_v29 = vadd.f32 %v892_v11, %v3801_v22  ;;  %v894_v55 = vpop.f32.mrb[41].mxu0  ;;  %2641 = vmatpush3.bf16.xpose.msra.mxu1 %v1177_v24 }
 0x1eb   : > { %v896_v42 = vpop.f32.mrb[42].mxu0  ;;  %v895_v12 = vadd.f32 %v894_v55, %v3805_v31 }
 0x1ec   : > { %v897_v34 = vadd.f32 %v896_v42, %v3801_v22  ;;  %v898_v4 = vpop.f32.mrb[43].mxu0  ;;  %v1132_v16 = vmul.f32 0.088388346, %v893_v29 }
 0x1ed   : > { %v899_v61 = vadd.f32 %v898_v4, %v3805_v31 }
 0x1ee   : > { %v1133_v49 = vmul.f32 0.088388346, %v897_v34 }
 0x1ef   : > { %v1186_v43 = vpack.c.bf16 %v899_v61, %v895_v12 }
 0x1f0   : > { %v4030_v53 = vpack.c.bf16 %v1133_v49, %v1132_v16 }
 0x1f1   : > { %v902_v3 = vpop.f32.mrb[44].mxu0  ;;  %2642 = vmatprep.subr.bf16.mxu1 %v1186_v43 }
 0x1f2   : > { %v903_v28 = vadd.f32 %v902_v3, %v3801_v22  ;;  %v904_v63 = vpop.f32.mrb[45].mxu0  ;;  %2643 = vmatpush3.bf16.xpose.msra.mxu1 %v1178_v6 }
 0x1f3   : > { %v906_v58 = vpop.f32.mrb[46].mxu0  ;;  %v905_v15 = vadd.f32 %v904_v63, %v3805_v31 }
 0x1f4   : > { %v907_v48 = vadd.f32 %v906_v58, %v3801_v22  ;;  %v908_v24 = vpop.f32.mrb[47].mxu0  ;;  %v1134_v9 = vmul.f32 0.088388346, %v903_v28 }
 0x1f5   : > { %v909_v37 = vadd.f32 %v908_v24, %v3805_v31 }
 0x1f6   : > { %v1135_v25 = vmul.f32 0.088388346, %v907_v48 }
 0x1f7   : > { %v1187_v62 = vpack.c.bf16 %v909_v37, %v905_v15 }
 0x1f8   : > { %v4039_v7 = vpack.c.bf16 %v1135_v25, %v1134_v9 }
 0x1f9   : > { %v912_v20 = vpop.f32.mrb[48].mxu0  ;;  %2644 = vmatprep.subr.bf16.mxu1 %v1187_v62 }
 0x1fa   : > { %v913_v27 = vadd.f32 %v912_v20, %v3801_v22  ;;  %v914_v54 = vpop.f32.mrb[49].mxu0  ;;  %2645 = vmatpush3.bf16.xpose.msra.mxu1 %v1179_v0 }
 0x1fb   : > { %v916_v35 = vpop.f32.mrb[50].mxu0  ;;  %v915_v52 = vadd.f32 %v914_v54, %v3805_v31 }
 0x1fc   : > { %v917_v36 = vadd.f32 %v916_v35, %v3801_v22  ;;  %v918_v6 = vpop.f32.mrb[51].mxu0  ;;  %v1136_v1 = vmul.f32 0.088388346, %v913_v27 }
 0x1fd   : > { %v919_v59 = vadd.f32 %v918_v6, %v3805_v31 }
 0x1fe   : > { %v1137_v38 = vmul.f32 0.088388346, %v917_v36 }
 0x1ff   : > { %v1188_v13 = vpack.c.bf16 %v919_v59, %v915_v52 }
 0x200   : > { %v4048_v14 = vpack.c.bf16 %v1137_v38, %v1136_v1 }
 0x201   : > { %v922_v30 = vpop.f32.mrb[52].mxu0  ;;  %2646 = vmatprep.subr.bf16.mxu1 %v1188_v13 }
 0x202   : > { %v923_v11 = vadd.f32 %v922_v30, %v3801_v22  ;;  %v924_v29 = vpop.f32.mrb[53].mxu0  ;;  %2647 = vmatpush3.bf16.xpose.msra.mxu1 %v1180_v57 }
 0x203   : > { %v926_v21 = vpop.f32.mrb[54].mxu0  ;;  %v925_v55 = vadd.f32 %v924_v29, %v3805_v31 }
 0x204   : > { %v927_v56 = vadd.f32 %v926_v21, %v3801_v22  ;;  %v928_v0 = vpop.f32.mrb[55].mxu0  ;;  %v1138_v34 = vmul.f32 0.088388346, %v923_v11 }
 0x205   : > { %v929_v42 = vadd.f32 %v928_v0, %v3805_v31 }
 0x206   : > { %v1139_v4 = vmul.f32 0.088388346, %v927_v56 }
 0x207   : > { %v1189_v12 = vpack.c.bf16 %v929_v42, %v925_v55 }
 0x208   : > { %v1157_v61 = vpack.c.bf16 %v1139_v4, %v1138_v34 }
 0x209   : > { %v932_v16 = vpop.f32.mrb[56].mxu0  ;;  %2648 = vmatprep.subr.bf16.mxu1 %v1189_v12 }
 0x20a   : > { %v933_v49 = vadd.f32 %v932_v16, %v3801_v22  ;;  %v934_v43 = vpop.f32.mrb[57].mxu0  ;;  %2649 = vmatpush3.bf16.xpose.msra.mxu1 %v1181_v46 }
 0x20b   : > { %v936_v41 = vpop.f32.mrb[58].mxu0  ;;  %v935_v3 = vadd.f32 %v934_v43, %v3805_v31 }
 0x20c   : > { %v937_v19 = vadd.f32 %v936_v41, %v3801_v22  ;;  %v938_v57 = vpop.f32.mrb[59].mxu0  ;;  %v1140_v63 = vmul.f32 0.088388346, %v933_v49 }
 0x20d   : > { %v939_v28 = vadd.f32 %v938_v57, %v3805_v31 }
 0x20e   : > { %v1141_v58 = vmul.f32 0.088388346, %v937_v19 }
 0x20f   : > { %v1190_v48 = vpack.c.bf16 %v939_v28, %v935_v3 }
 0x210   : > { %v1158_v24 = vpack.c.bf16 %v1141_v58, %v1140_v63 }
 0x211   : > { %v942_v15 = vpop.f32.mrb[60].mxu0  ;;  %2650 = vmatprep.subr.bf16.mxu1 %v1190_v48 }
 0x212   : > { %v943_v37 = vadd.f32 %v942_v15, %v3801_v22  ;;  %v944_v9 = vpop.f32.mrb[61].mxu0  ;;  %2651 = vmatpush3.bf16.xpose.msra.mxu1 %v1182_v23 }
 0x213   : > { %v946_v45 = vpop.f32.mrb[62].mxu0  ;;  %v945_v25 = vadd.f32 %v944_v9, %v3805_v31 }
 0x214   : > { %v947_v50 = vadd.f32 %v946_v45, %v3801_v22  ;;  %v948_v46 = vpop.f32.mrb[63].mxu0  ;;  %v1142_v20 = vmul.f32 0.088388346, %v943_v37 }
 0x215   : > { %v949_v62 = vadd.f32 %v948_v46, %v3805_v31 }
 0x216   : > { %v1143_v27 = vmul.f32 0.088388346, %v947_v50 }
 0x217   : > { %v1191_v54 = vpack.c.bf16 %v949_v62, %v945_v25 }
 0x218   : > { %v1159_v35 = vpack.c.bf16 %v1143_v27, %v1142_v20 }
 0x219   : > { %2652 = vmatprep.subr.bf16.mxu1 %v1191_v54 }
 0x21a   : > { %2653 = vmatpush3.bf16.xpose.msra.mxu1 %v1183_v33 }
 0x221   : > { %2655 = vmatmul.mubr.bf16.vlgmr.msra.gmra.mrb[32].mxu1 %v3831_v8 }
 0x222   : > { %2656 = vmatprep.mubr.bf16.mxu1 %v3860_v2 }
 0x229   : > { %2657 = vmatmul.mubr.bf16.gmra.mrb[36].mxu1 %v3860_v2 }
 0x22a   : > { %2658 = vmatprep.mubr.bf16.mxu1 %v3888_v32 }
 0x231   : > { %2659 = vmatmul.mubr.bf16.gmra.mrb[40].mxu1 %v3888_v32 }
 0x232   : > { %2660 = vmatprep.mubr.bf16.mxu1 %v3916_v26 }
 0x239   : > { %2661 = vmatmul.mubr.bf16.gmra.mrb[44].mxu1 %v3916_v26 }
 0x23a   : > { %2662 = vmatprep.mubr.bf16.mxu1 %v3934_v60 }
 0x241   : > { %2663 = vmatmul.mubr.bf16.gmra.mrb[48].mxu1 %v3934_v60 }
 0x242   : > { %2664 = vmatprep.mubr.bf16.mxu1 %v3956_v47 }
 0x249   : > { %2665 = vmatmul.mubr.bf16.gmra.mrb[52].mxu1 %v3956_v47 }
 0x24a   : > { %2666 = vmatprep.mubr.bf16.mxu1 %v3978_v5 }
 0x251   : > { %2667 = vmatmul.mubr.bf16.gmra.mrb[56].mxu1 %v3978_v5 }
 0x252   : > { %2668 = vmatprep.mubr.bf16.mxu1 %v4000_v40 }
 0x259   : > { %2669 = vmatmul.mubr.bf16.gmra.mrb[60].mxu1 %v4000_v40 }
 0x25a   : > { %2670 = vmatprep.mubr.bf16.mxu1 %v4012_v17 }
 0x261   : > { %2671 = vmatmul.mubr.bf16.gmra.mrb[64].mxu1 %v4012_v17 }
 0x262   : > { %2672 = vmatprep.mubr.bf16.mxu1 %v4021_v18 }
 0x269   : > { %2673 = vmatmul.mubr.bf16.gmra.mrb[68].mxu1 %v4021_v18 }
 0x26a   : > { %2674 = vmatprep.mubr.bf16.mxu1 %v4030_v53 }
 0x271   : > { %2675 = vmatmul.mubr.bf16.gmra.mrb[72].mxu1 %v4030_v53 }
 0x272   : > { %2676 = vmatprep.mubr.bf16.mxu1 %v4039_v7 }
 0x279   : > { %2677 = vmatmul.mubr.bf16.gmra.mrb[76].mxu1 %v4039_v7 }
 0x27a   : > { %2678 = vmatprep.mubr.bf16.mxu1 %v4048_v14 }
 0x281   : > { %2679 = vmatmul.mubr.bf16.gmra.mrb[80].mxu1 %v4048_v14 }
 0x282   : > { %2680 = vmatprep.mubr.bf16.mxu1 %v1157_v61 }
 0x289   : > { %2681 = vmatmul.mubr.bf16.gmra.mrb[84].mxu1 %v1157_v61 }
 0x28a   : > { %2682 = vmatprep.mubr.bf16.mxu1 %v1158_v24 }
 0x291   : > { %2683 = vmatmul.mubr.bf16.gmra.mrb[88].mxu1 %v1158_v24 }
 0x292   : > { %2684 = vmatprep.mubr.bf16.mxu1 %v1159_v35 }
 0x299   : > { %2685 = vmatmul.mubr.bf16.gmra.mrb[92].mxu1 %v1159_v35 }
 0x2f4   : > { %v4099_v22 = vpop.f32.mrb[32].mxu1 }
 0x2f5   : > { %v4101_v31 = vpop.f32.mrb[33].mxu1 }
 0x2f6   : > { %v4103_v8 = vpop.f32.mrb[34].mxu1  ;;  %v1470_v2 = vmax.f32 %v4099_v22, %v4101_v31 }
 0x2f7   : > { %v4107_v32 = vpop.f32.mrb[35].mxu1 }
 0x2f8   : > { %1471 = vmax.xlane.f32.xlu0 %v1470_v2  ;;  %v1473_v26 = vmax.f32 %v4103_v8, %v4107_v32 }
 0x2fa   : > { %1474 = vmax.xlane.f32.xlu1 %v1473_v26 }
 0x2fc   : > { %v4111_v60 = vpop.f32.mrb[36].mxu1 }
 0x2fd   : > { %v4113_v47 = vpop.f32.mrb[37].mxu1 }
 0x2fe   : > { %v4115_v10 = vpop.f32.mrb[38].mxu1  ;;  %v1476_v51 = vmax.f32 %v4111_v60, %v4113_v47 }
 0x2ff   : > { %v4119_v23 = vpop.f32.mrb[39].mxu1 }
 0x300   : > { %1477 = vmax.xlane.f32.xlu0 %v1476_v51  ;;  %v1479_v5 = vmax.f32 %v4115_v10, %v4119_v23 }
 0x302   : > { %1480 = vmax.xlane.f32.xlu1 %v1479_v5 }
 0x304   : > { %v4123_v44 = vpop.f32.mrb[40].mxu1 }
 0x305   : > { %v4125_v39 = vpop.f32.mrb[41].mxu1 }
 0x306   : > { %v4127_v33 = vpop.f32.mrb[42].mxu1  ;;  %v1482_v40 = vmax.f32 %v4123_v44, %v4125_v39 }
 0x307   : > { %v4131_v17 = vpop.f32.mrb[43].mxu1 }
 0x308   : > { %1483 = vmax.xlane.f32.xlu0 %v1482_v40  ;;  %v1485_v18 = vmax.f32 %v4127_v33, %v4131_v17 }
 0x30a   : > { %1486 = vmax.xlane.f32.xlu1 %v1485_v18 }
 0x30c   : > { %v4135_v53 = vpop.f32.mrb[44].mxu1 }
 0x30d   : > { %v4137_v7 = vpop.f32.mrb[45].mxu1 }
 0x30e   : > { %v4139_v36 = vpop.f32.mrb[46].mxu1  ;;  %v1488_v6 = vmax.f32 %v4135_v53, %v4137_v7 }
 0x30f   : > { %v4143_v52 = vpop.f32.mrb[47].mxu1 }
 0x310   : > { %1489 = vmax.xlane.f32.xlu0 %v1488_v6  ;;  %v1491_v59 = vmax.f32 %v4139_v36, %v4143_v52 }
 0x312   : > { %1492 = vmax.xlane.f32.xlu1 %v1491_v59 }
 0x314   : > { %v4147_v1 = vpop.f32.mrb[48].mxu1 }
 0x315   : > { %v4149_v38 = vpop.f32.mrb[49].mxu1 }
 0x316   : > { %v4151_v13 = vpop.f32.mrb[50].mxu1  ;;  %v1494_v14 = vmax.f32 %v4147_v1, %v4149_v38 }
 0x317   : > { %v4155_v30 = vpop.f32.mrb[51].mxu1 }
 0x318   : > { %1495 = vmax.xlane.f32.xlu0 %v1494_v14  ;;  %v1497_v11 = vmax.f32 %v4151_v13, %v4155_v30 }
 0x31a   : > { %1498 = vmax.xlane.f32.xlu1 %v1497_v11 }
 0x31c   : > { %v4159_v29 = vpop.f32.mrb[52].mxu1 }
 0x31d   : > { %v4161_v21 = vpop.f32.mrb[53].mxu1 }
 0x31e   : > { %v4163_v56 = vpop.f32.mrb[54].mxu1  ;;  %v1500_v0 = vmax.f32 %v4159_v29, %v4161_v21 }
 0x31f   : > { %v4167_v55 = vpop.f32.mrb[55].mxu1 }
 0x320   : > { %1501 = vmax.xlane.f32.xlu0 %v1500_v0  ;;  %v1503_v42 = vmax.f32 %v4163_v56, %v4167_v55 }
 0x322   : > { %1504 = vmax.xlane.f32.xlu1 %v1503_v42 }
 0x324   : > { %v4171_v34 = vpop.f32.mrb[56].mxu1 }
 0x325   : > { %v4173_v4 = vpop.f32.mrb[57].mxu1 }
 0x326   : > { %v4175_v12 = vpop.f32.mrb[58].mxu1  ;;  %v1506_v61 = vmax.f32 %v4171_v34, %v4173_v4 }
 0x327   : > { %v4179_v16 = vpop.f32.mrb[59].mxu1 }
 0x328   : > { %1507 = vmax.xlane.f32.xlu0 %v1506_v61  ;;  %v1509_v49 = vmax.f32 %v4175_v12, %v4179_v16 }
 0x32a   : > { %1510 = vmax.xlane.f32.xlu1 %v1509_v49 }
 0x32c   : > { %v4183_v43 = vpop.f32.mrb[60].mxu1 }
 0x32d   : > { %v4185_v41 = vpop.f32.mrb[61].mxu1 }
 0x32e   : > { %v4187_v19 = vpop.f32.mrb[62].mxu1  ;;  %v1512_v57 = vmax.f32 %v4183_v43, %v4185_v41 }
 0x32f   : > { %v4191_v3 = vpop.f32.mrb[63].mxu1 }
 0x330   : > { %1513 = vmax.xlane.f32.xlu0 %v1512_v57  ;;  %v1515_v28 = vmax.f32 %v4187_v19, %v4191_v3 }
 0x332   : > { %1516 = vmax.xlane.f32.xlu1 %v1515_v28 }
 0x334   : > { %v4195_v63 = vpop.f32.mrb[64].mxu1 }
 0x335   : > { %v4197_v58 = vpop.f32.mrb[65].mxu1 }
 0x336   : > { %v4199_v48 = vpop.f32.mrb[66].mxu1  ;;  %v1518_v24 = vmax.f32 %v4195_v63, %v4197_v58 }
 0x337   : > { %v4203_v15 = vpop.f32.mrb[67].mxu1 }
 0x338   : > { %1519 = vmax.xlane.f32.xlu0 %v1518_v24  ;;  %v1521_v37 = vmax.f32 %v4199_v48, %v4203_v15 }
 0x33a   : > { %1522 = vmax.xlane.f32.xlu1 %v1521_v37 }
 0x33c   : > { %v4207_v9 = vpop.f32.mrb[68].mxu1 }
 0x33d   : > { %v4209_v45 = vpop.f32.mrb[69].mxu1 }
 0x33e   : > { %v4211_v50 = vpop.f32.mrb[70].mxu1  ;;  %v1524_v46 = vmax.f32 %v4207_v9, %v4209_v45 }
 0x33f   : > { %v4215_v25 = vpop.f32.mrb[71].mxu1 }
 0x340   : > { %1525 = vmax.xlane.f32.xlu0 %v1524_v46  ;;  %v1527_v62 = vmax.f32 %v4211_v50, %v4215_v25 }
 0x342   : > { %1528 = vmax.xlane.f32.xlu1 %v1527_v62 }
 0x344   : > { %v4219_v20 = vpop.f32.mrb[72].mxu1 }
 0x345   : > { %v4221_v27 = vpop.f32.mrb[73].mxu1 }
 0x346   : > { %v4223_v54 = vpop.f32.mrb[74].mxu1  ;;  %v1530_v35 = vmax.f32 %v4219_v20, %v4221_v27 }
 0x347   : > { %v4227_v2 = vpop.f32.mrb[75].mxu1 }
 0x348   : > { %1531 = vmax.xlane.f32.xlu0 %v1530_v35  ;;  %v1533_v26 = vmax.f32 %v4223_v54, %v4227_v2 }
 0x34a   : > { %1534 = vmax.xlane.f32.xlu1 %v1533_v26 }
 0x34c   : > { %v4231_v51 = vpop.f32.mrb[76].mxu1 }
 0x34d   : > { %v4233_v5 = vpop.f32.mrb[77].mxu1 }
 0x34e   : > { %v4235_v40 = vpop.f32.mrb[78].mxu1  ;;  %v1536_v18 = vmax.f32 %v4231_v51, %v4233_v5 }
 0x34f   : > { %v4239_v6 = vpop.f32.mrb[79].mxu1 }
 0x350   : > { %1537 = vmax.xlane.f32.xlu0 %v1536_v18  ;;  %v1539_v59 = vmax.f32 %v4235_v40, %v4239_v6 }
 0x352   : > { %1540 = vmax.xlane.f32.xlu1 %v1539_v59 }
 0x354   : > { %v4243_v14 = vpop.f32.mrb[80].mxu1 }
 0x355   : > { %v4245_v11 = vpop.f32.mrb[81].mxu1 }
 0x356   : > { %v4247_v0 = vpop.f32.mrb[82].mxu1  ;;  %v1542_v42 = vmax.f32 %v4243_v14, %v4245_v11 }
 0x357   : > { %4564 = vst [vmem:[#allocation8_spill] sm:$0xff] %v4247_v0  ;;  %v4251_v61 = vpop.f32.mrb[83].mxu1 }
 0x358   : > { %4565 = vst [vmem:[#allocation9_spill] sm:$0xff] %v4251_v61  ;;  %1543 = vmax.xlane.f32.xlu0 %v1542_v42  ;;  %v1545_v49 = vmax.f32 %v4247_v0, %v4251_v61 }
 0x35a   : > { %1546 = vmax.xlane.f32.xlu1 %v1545_v49 }
 0x35c   : > { %v4255_v57 = vpop.f32.mrb[84].mxu1 }
 0x35d   : > { %4566 = vst [vmem:[#allocation10_spill] sm:$0xff] %v4255_v57  ;;  %v4257_v28 = vpop.f32.mrb[85].mxu1 }
 0x35e   : > { %4567 = vst [vmem:[#allocation11_spill] sm:$0xff] %v4257_v28  ;;  %v4259_v24 = vpop.f32.mrb[86].mxu1  ;;  %v1548_v37 = vmax.f32 %v4255_v57, %v4257_v28 }
 0x35f   : > { %4568 = vst [vmem:[#allocation12_spill] sm:$0xff] %v4259_v24  ;;  %v4263_v46 = vpop.f32.mrb[87].mxu1 }
 0x360   : > { %4569 = vst [vmem:[#allocation13_spill] sm:$0xff] %v4263_v46  ;;  %1549 = vmax.xlane.f32.xlu0 %v1548_v37  ;;  %v1551_v62 = vmax.f32 %v4259_v24, %v4263_v46 }
 0x362   : > { %1552 = vmax.xlane.f32.xlu1 %v1551_v62 }
 0x364   : > { %v4267_v35 = vpop.f32.mrb[88].mxu1 }
 0x365   : > { %4570 = vst [vmem:[#allocation14_spill] sm:$0xff] %v4267_v35  ;;  %v4269_v26 = vpop.f32.mrb[89].mxu1 }
 0x366   : > { %4571 = vst [vmem:[#allocation15_spill] sm:$0xff] %v4269_v26  ;;  %v4271_v18 = vpop.f32.mrb[90].mxu1  ;;  %v1554_v59 = vmax.f32 %v4267_v35, %v4269_v26 }
 0x367   : > { %4572 = vst [vmem:[#allocation16_spill] sm:$0xff] %v4271_v18  ;;  %v4275_v42 = vpop.f32.mrb[91].mxu1 }
 0x368   : > { %4573 = vst [vmem:[#allocation17_spill] sm:$0xff] %v4275_v42  ;;  %1555 = vmax.xlane.f32.xlu0 %v1554_v59  ;;  %v1557_v49 = vmax.f32 %v4271_v18, %v4275_v42 }
 0x36a   : > { %1558 = vmax.xlane.f32.xlu1 %v1557_v49 }
 0x36c   : > { %v4279_v37 = vpop.f32.mrb[92].mxu1 }
 0x36d   : > { %4574 = vst [vmem:[#allocation18_spill] sm:$0xff] %v4279_v37  ;;  %v4281_v46 = vpop.f32.mrb[93].mxu1 }
 0x36e   : > { %4575 = vst [vmem:[#allocation19_spill] sm:$0xff] %v4281_v46  ;;  %v4283_v62 = vpop.f32.mrb[94].mxu1  ;;  %v1560_v24 = vmax.f32 %v4279_v37, %v4281_v46 }
 0x36f   : > { %v4287_v28 = vpop.f32.mrb[95].mxu1 }
 0x370   : > { %4576 = vst [vmem:[#allocation20_spill] sm:$0xff] %v4287_v28  ;;  %1561 = vmax.xlane.f32.xlu0 %v1560_v24  ;;  %v1563_v26 = vmax.f32 %v4283_v62, %v4287_v28 }
 0x372   : > { %1564 = vmax.xlane.f32.xlu1 %v1563_v26 }
 0x385   : > { %v1472_v59 = vpop.xlane.xlu0 %1471 }
 0x386   : > { %v1566_v42 = vsub.f32 %v4099_v22, %v1472_v59  ;;  %v1567_v49 = vsub.f32 %v4101_v31, %v1472_v59 }
 0x387   : > { %v1475_v18 = vpop.xlane.xlu1 %1474 }
 0x388   : > { %v1630_v35 = vmul.f32 1.442695, %v1566_v42  ;;  %v1632_v57 = vmul.f32 1.442695, %v1567_v49  ;;  %v1568_v61 = vsub.f32 %v4103_v8, %v1475_v18  ;;  %v1569_v0 = vsub.f32 %v4107_v32, %v1475_v18 }
 0x38a   : > { %3080 = vpow2.f32 %v1630_v35  ;;  %v1634_v46 = vmul.f32 1.442695, %v1568_v61  ;;  %v1636_v37 = vmul.f32 1.442695, %v1569_v0 }
 0x38b   : > { %3082 = vpow2.f32 %v1632_v57 }
 0x38c   : > { %3084 = vpow2.f32 %v1634_v46 }
 0x38d   : > { %3086 = vpow2.f32 %v1636_v37  ;;  %v1478_v24 = vpop.xlane.xlu0 %1477 }
 0x38e   : > { %v1570_v26 = vsub.f32 %v4111_v60, %v1478_v24  ;;  %v1571_v22 = vsub.f32 %v4113_v47, %v1478_v24 }
 0x38f   : > { %v1481_v28 = vpop.xlane.xlu1 %1480 }
 0x390   : > { %v1638_v31 = vmul.f32 1.442695, %v1570_v26  ;;  %v1640_v59 = vmul.f32 1.442695, %v1571_v22  ;;  %v1572_v42 = vsub.f32 %v4115_v10, %v1481_v28  ;;  %v1573_v8 = vsub.f32 %v4119_v23, %v1481_v28 }
 0x392   : > { %3088 = vpow2.f32 %v1638_v31  ;;  %v1642_v32 = vmul.f32 1.442695, %v1572_v42  ;;  %v1644_v35 = vmul.f32 1.442695, %v1573_v8 }
 0x393   : > { %3090 = vpow2.f32 %v1640_v59 }
 0x394   : > { %v3081_v0 = vpop.eup %3080  ;;  %3092 = vpow2.f32 %v1642_v32 }
 0x395   : > { %v3083_v61 = vpop.eup %3082  ;;  %3094 = vpow2.f32 %v1644_v35  ;;  %v1484_v57 = vpop.xlane.xlu0 %1483 }
 0x396   : > { %v3085_v46 = vpop.eup %3084  ;;  %v1574_v60 = vsub.f32 %v4123_v44, %v1484_v57  ;;  %v1575_v47 = vsub.f32 %v4125_v39, %v1484_v57  ;;  %v1758_v18 = vadd.f32 %v3083_v61, %v3081_v0 }
 0x397   : > { %v3087_v37 = vpop.eup %3086  ;;  %v1487_v49 = vpop.xlane.xlu1 %1486  ;;  %v1854_v10 = vpack.c.bf16 %v3085_v46, %v3081_v0 }
 0x398   : > { %v1646_v24 = vmul.f32 1.442695, %v1574_v60  ;;  %v1648_v23 = vmul.f32 1.442695, %v1575_v47  ;;  %v1576_v28 = vsub.f32 %v4127_v33, %v1487_v49  ;;  %v1577_v26 = vsub.f32 %v4131_v17, %v1487_v49  ;;  %1759 = vadd.xlane.f32.xlu0 %v1758_v18 }
 0x399   : > { %v1855_v22 = vpack.c.bf16 %v3087_v37, %v3083_v61  ;;  %v1761_v31 = vadd.f32 %v3087_v37, %v3085_v46 }
 0x39a   : > { %3096 = vpow2.f32 %v1646_v24  ;;  %v1650_v59 = vmul.f32 1.442695, %v1576_v28  ;;  %v1652_v42 = vmul.f32 1.442695, %v1577_v26 }
 0x39b   : > { %3098 = vpow2.f32 %v1648_v23  ;;  %1934 = vmatprep.mubr.bf16.mxu0 %v1855_v22  ;;  %1762 = vadd.xlane.f32.xlu1 %v1761_v31 }
 0x39c   : > { %v3089_v44 = vpop.eup %3088  ;;  %3100 = vpow2.f32 %v1650_v59  ;;  %1935 = vmatmul.mubr.bf16.vlgmr.msra.gmra.mrb[64].mxu0 %v1854_v10 }
 0x39d   : > { %v3091_v39 = vpop.eup %3090  ;;  %3102 = vpow2.f32 %v1652_v42  ;;  %v1490_v8 = vpop.xlane.xlu0 %1489 }
 0x39e   : > { %v3093_v32 = vpop.eup %3092  ;;  %v1578_v33 = vsub.f32 %v4135_v53, %v1490_v8  ;;  %v1579_v17 = vsub.f32 %v4137_v7, %v1490_v8  ;;  %v1764_v35 = vadd.f32 %v3091_v39, %v3089_v44 }
 0x39f   : > { %v3095_v0 = vpop.eup %3094  ;;  %v1493_v61 = vpop.xlane.xlu1 %1492  ;;  %v1856_v57 = vpack.c.bf16 %v3093_v32, %v3089_v44 }
 0x3a0   : > { %v1654_v46 = vmul.f32 1.442695, %v1578_v33  ;;  %v1656_v60 = vmul.f32 1.442695, %v1579_v17  ;;  %v1580_v47 = vsub.f32 %v4139_v36, %v1493_v61  ;;  %v1581_v18 = vsub.f32 %v4143_v52, %v1493_v61  ;;  %1765 = vadd.xlane.f32.xlu0 %v1764_v35 }
 0x3a1   : > { %v1857_v37 = vpack.c.bf16 %v3095_v0, %v3091_v39  ;;  %v1767_v49 = vadd.f32 %v3095_v0, %v3093_v32 }
 0x3a2   : > { %3104 = vpow2.f32 %v1654_v46  ;;  %v1658_v10 = vmul.f32 1.442695, %v1580_v47  ;;  %v1660_v24 = vmul.f32 1.442695, %v1581_v18 }
 0x3a3   : > { %3106 = vpow2.f32 %v1656_v60  ;;  %1942 = vmatprep.mubr.bf16.mxu0 %v1857_v37  ;;  %1768 = vadd.xlane.f32.xlu1 %v1767_v49 }
 0x3a4   : > { %v3097_v53 = vpop.eup %3096  ;;  %3108 = vpow2.f32 %v1658_v10  ;;  %1943 = vmatmul.mubr.bf16.gmra.mrb[68].mxu0 %v1856_v57 }
 0x3a5   : > { %v3099_v7 = vpop.eup %3098  ;;  %3110 = vpow2.f32 %v1660_v24  ;;  %v1496_v23 = vpop.xlane.xlu0 %1495 }
 0x3a6   : > { %v3101_v28 = vpop.eup %3100  ;;  %v1582_v36 = vsub.f32 %v4147_v1, %v1496_v23  ;;  %v1583_v52 = vsub.f32 %v4149_v38, %v1496_v23  ;;  %v1770_v26 = vadd.f32 %v3099_v7, %v3097_v53 }
 0x3a7   : > { %v3103_v22 = vpop.eup %3102  ;;  %v1499_v31 = vpop.xlane.xlu1 %1498  ;;  %v1858_v59 = vpack.c.bf16 %v3101_v28, %v3097_v53 }
 0x3a8   : > { %v1662_v42 = vmul.f32 1.442695, %v1582_v36  ;;  %v1664_v44 = vmul.f32 1.442695, %v1583_v52  ;;  %v1584_v39 = vsub.f32 %v4151_v13, %v1499_v31  ;;  %v1585_v8 = vsub.f32 %v4155_v30, %v1499_v31  ;;  %1771 = vadd.xlane.f32.xlu0 %v1770_v26 }
 0x3a9   : > { %v1859_v32 = vpack.c.bf16 %v3103_v22, %v3099_v7  ;;  %v1773_v33 = vadd.f32 %v3103_v22, %v3101_v28 }
 0x3aa   : > { %3112 = vpow2.f32 %v1662_v42  ;;  %v1666_v17 = vmul.f32 1.442695, %v1584_v39  ;;  %v1668_v35 = vmul.f32 1.442695, %v1585_v8 }
 0x3ab   : > { %3114 = vpow2.f32 %v1664_v44  ;;  %1950 = vmatprep.mubr.bf16.mxu0 %v1859_v32  ;;  %1774 = vadd.xlane.f32.xlu1 %v1773_v33  ;;  %v3008_v33 = vld [vmem:[%s4546_s4] sm:$0xff]  }
 0x3ac   : > { %v3105_v1 = vpop.eup %3104  ;;  %3116 = vpow2.f32 %v1666_v17  ;;  %1951 = vmatmul.mubr.bf16.gmra.mrb[72].mxu0 %v1858_v59  ;;  %2870 = vmatprep.subr.bf16.mxu1 %v3008_v33 }
 0x3ad   : > { %v3107_v38 = vpop.eup %3106  ;;  %3118 = vpow2.f32 %v1668_v35  ;;  %v1502_v0 = vpop.xlane.xlu0 %1501  ;;  %2871 = vmatpush3.bf16.msra.mxu1 %v3008_v33 }
 0x3ae   : > { %v3109_v61 = vpop.eup %3108  ;;  %v1586_v13 = vsub.f32 %v4159_v29, %v1502_v0  ;;  %v1587_v30 = vsub.f32 %v4161_v21, %v1502_v0  ;;  %v1776_v57 = vadd.f32 %v3107_v38, %v3105_v1 }
 0x3af   : > { %v3111_v46 = vpop.eup %3110  ;;  %v1505_v60 = vpop.xlane.xlu1 %1504  ;;  %v1860_v47 = vpack.c.bf16 %v3109_v61, %v3105_v1 }
 0x3b0   : > { %v1670_v18 = vmul.f32 1.442695, %v1586_v13  ;;  %v1672_v37 = vmul.f32 1.442695, %v1587_v30  ;;  %v1588_v49 = vsub.f32 %v4163_v56, %v1505_v60  ;;  %v1589_v10 = vsub.f32 %v4167_v55, %v1505_v60  ;;  %1777 = vadd.xlane.f32.xlu0 %v1776_v57 }
 0x3b1   : > { %v1861_v24 = vpack.c.bf16 %v3111_v46, %v3107_v38  ;;  %v1779_v53 = vadd.f32 %v3111_v46, %v3109_v61 }
 0x3b2   : > { %3120 = vpow2.f32 %v1670_v18  ;;  %v1674_v7 = vmul.f32 1.442695, %v1588_v49  ;;  %v1676_v23 = vmul.f32 1.442695, %v1589_v10 }
 0x3b3   : > { %3122 = vpow2.f32 %v1672_v37  ;;  %1958 = vmatprep.mubr.bf16.mxu0 %v1861_v24  ;;  %1780 = vadd.xlane.f32.xlu1 %v1779_v53 }
 0x3b4   : > { %v3113_v29 = vpop.eup %3112  ;;  %3124 = vpow2.f32 %v1674_v7  ;;  %1959 = vmatmul.mubr.bf16.gmra.mrb[76].mxu0 %v1860_v47 }
 0x3b5   : > { %v3115_v21 = vpop.eup %3114  ;;  %3126 = vpow2.f32 %v1676_v23  ;;  %v1508_v28 = vpop.xlane.xlu0 %1507 }
 0x3b6   : > { %v3117_v36 = vpop.eup %3116  ;;  %v1590_v56 = vsub.f32 %v4171_v34, %v1508_v28  ;;  %v1591_v55 = vsub.f32 %v4173_v4, %v1508_v28  ;;  %v1782_v52 = vadd.f32 %v3115_v21, %v3113_v29 }
 0x3b7   : > { %v3119_v26 = vpop.eup %3118  ;;  %v1511_v22 = vpop.xlane.xlu1 %1510  ;;  %v1862_v31 = vpack.c.bf16 %v3117_v36, %v3113_v29 }
 0x3b8   : > { %v1678_v59 = vmul.f32 1.442695, %v1590_v56  ;;  %v1680_v42 = vmul.f32 1.442695, %v1591_v55  ;;  %v1592_v44 = vsub.f32 %v4175_v12, %v1511_v22  ;;  %v1593_v39 = vsub.f32 %v4179_v16, %v1511_v22  ;;  %1783 = vadd.xlane.f32.xlu0 %v1782_v52  ;;  %v3009_v22 = vld [vmem:[%s4546_s4 + $0x8] sm:$0xff]  }
 0x3b9   : > { %v1863_v8 = vpack.c.bf16 %v3119_v26, %v3115_v21  ;;  %v1785_v32 = vadd.f32 %v3119_v26, %v3117_v36  ;;  %2872 = vmatprep.subr.bf16.mxu1 %v3009_v22 }
 0x3ba   : > { %3128 = vpow2.f32 %v1678_v59  ;;  %v1682_v34 = vmul.f32 1.442695, %v1592_v44  ;;  %v1684_v4 = vmul.f32 1.442695, %v1593_v39  ;;  %2873 = vmatpush3.bf16.msra.mxu1 %v3009_v22 }
 0x3bb   : > { %3130 = vpow2.f32 %v1680_v42  ;;  %1966 = vmatprep.mubr.bf16.mxu0 %v1863_v8  ;;  %1786 = vadd.xlane.f32.xlu1 %v1785_v32 }
 0x3bc   : > { %v3121_v17 = vpop.eup %3120  ;;  %3132 = vpow2.f32 %v1682_v34  ;;  %1967 = vmatmul.mubr.bf16.gmra.mrb[80].mxu0 %v1862_v31 }
 0x3bd   : > { %v3123_v12 = vpop.eup %3122  ;;  %3134 = vpow2.f32 %v1684_v4  ;;  %v1514_v16 = vpop.xlane.xlu0 %1513 }
 0x3be   : > { %v3125_v35 = vpop.eup %3124  ;;  %v1594_v1 = vsub.f32 %v4183_v43, %v1514_v16  ;;  %v1595_v38 = vsub.f32 %v4185_v41, %v1514_v16  ;;  %v1788_v0 = vadd.f32 %v3123_v12, %v3121_v17 }
 0x3bf   : > { %v3127_v61 = vpop.eup %3126  ;;  %v1517_v13 = vpop.xlane.xlu1 %1516  ;;  %v1864_v30 = vpack.c.bf16 %v3125_v35, %v3121_v17 }
 0x3c0   : > { %v1686_v57 = vmul.f32 1.442695, %v1594_v1  ;;  %v1688_v46 = vmul.f32 1.442695, %v1595_v38  ;;  %v1596_v60 = vsub.f32 %v4187_v19, %v1517_v13  ;;  %v1597_v47 = vsub.f32 %v4191_v3, %v1517_v13  ;;  %1789 = vadd.xlane.f32.xlu0 %v1788_v0 }
 0x3c1   : > { %v1865_v18 = vpack.c.bf16 %v3127_v61, %v3123_v12  ;;  %v1791_v37 = vadd.f32 %v3127_v61, %v3125_v35 }
 0x3c2   : > { %3136 = vpow2.f32 %v1686_v57  ;;  %v1690_v49 = vmul.f32 1.442695, %v1596_v60  ;;  %v1692_v10 = vmul.f32 1.442695, %v1597_v47 }
 0x3c3   : > { %3138 = vpow2.f32 %v1688_v46  ;;  %1974 = vmatprep.mubr.bf16.mxu0 %v1865_v18  ;;  %1792 = vadd.xlane.f32.xlu1 %v1791_v37 }
 0x3c4   : > { %v3129_v43 = vpop.eup %3128  ;;  %3140 = vpow2.f32 %v1690_v49  ;;  %1975 = vmatmul.mubr.bf16.gmra.mrb[84].mxu0 %v1864_v30 }
 0x3c5   : > { %v3131_v41 = vpop.eup %3130  ;;  %3142 = vpow2.f32 %v1692_v10  ;;  %v1520_v24 = vpop.xlane.xlu0 %1519 }
 0x3c6   : > { %v3133_v53 = vpop.eup %3132  ;;  %v1598_v19 = vsub.f32 %v4195_v63, %v1520_v24  ;;  %v1599_v3 = vsub.f32 %v4197_v58, %v1520_v24  ;;  %v1794_v7 = vadd.f32 %v3131_v41, %v3129_v43 }
 0x3c7   : > { %v3135_v23 = vpop.eup %3134  ;;  %v1523_v29 = vpop.xlane.xlu1 %1522  ;;  %v1866_v21 = vpack.c.bf16 %v3133_v53, %v3129_v43  ;;  %v3010_v43 = vld [vmem:[%s4546_s4 + $0x10] sm:$0xff]  }
 0x3c8   : > { %v1694_v28 = vmul.f32 1.442695, %v1598_v19  ;;  %v1696_v36 = vmul.f32 1.442695, %v1599_v3  ;;  %v1600_v56 = vsub.f32 %v4199_v48, %v1523_v29  ;;  %v1601_v55 = vsub.f32 %v4203_v15, %v1523_v29  ;;  %1795 = vadd.xlane.f32.xlu0 %v1794_v7  ;;  %2874 = vmatprep.subr.bf16.mxu1 %v3010_v43 }
 0x3c9   : > { %v1867_v52 = vpack.c.bf16 %v3135_v23, %v3131_v41  ;;  %v1797_v26 = vadd.f32 %v3135_v23, %v3133_v53  ;;  %2875 = vmatpush3.bf16.msra.mxu1 %v3010_v43 }
 0x3ca   : > { %3144 = vpow2.f32 %v1694_v28  ;;  %v1698_v63 = vmul.f32 1.442695, %v1600_v56  ;;  %v1700_v58 = vmul.f32 1.442695, %v1601_v55 }
 0x3cb   : > { %3146 = vpow2.f32 %v1696_v36  ;;  %1982 = vmatprep.mubr.bf16.mxu0 %v1867_v52  ;;  %1798 = vadd.xlane.f32.xlu1 %v1797_v26 }
 0x3cc   : > { %v3137_v31 = vpop.eup %3136  ;;  %3148 = vpow2.f32 %v1698_v63  ;;  %1983 = vmatmul.mubr.bf16.gmra.mrb[88].mxu0 %v1866_v21 }
 0x3cd   : > { %v3139_v48 = vpop.eup %3138  ;;  %3150 = vpow2.f32 %v1700_v58  ;;  %v1526_v15 = vpop.xlane.xlu0 %1525 }
 0x3ce   : > { %v3141_v59 = vpop.eup %3140  ;;  %v1602_v42 = vsub.f32 %v4207_v9, %v1526_v15  ;;  %v1603_v44 = vsub.f32 %v4209_v45, %v1526_v15  ;;  %v1800_v39 = vadd.f32 %v3139_v48, %v3137_v31 }
 0x3cf   : > { %v3143_v8 = vpop.eup %3142  ;;  %v1529_v32 = vpop.xlane.xlu1 %1528  ;;  %v1868_v33 = vpack.c.bf16 %v3141_v59, %v3137_v31 }
 0x3d0   : > { %v1702_v34 = vmul.f32 1.442695, %v1602_v42  ;;  %v1704_v4 = vmul.f32 1.442695, %v1603_v44  ;;  %v1604_v17 = vsub.f32 %v4211_v50, %v1529_v32  ;;  %v1605_v12 = vsub.f32 %v4215_v25, %v1529_v32  ;;  %1801 = vadd.xlane.f32.xlu0 %v1800_v39  ;;  %v4577_v39 = vld [vmem:[#allocation8_spill] sm:$0xff]  ;;  %v4578_v32 = vld [vmem:[#allocation9_spill] sm:$0xff] }
 0x3d1   : > { %v1869_v16 = vpack.c.bf16 %v3143_v8, %v3139_v48  ;;  %v1803_v35 = vadd.f32 %v3143_v8, %v3141_v59 }
 0x3d2   : > { %3152 = vpow2.f32 %v1702_v34  ;;  %v1706_v1 = vmul.f32 1.442695, %v1604_v17  ;;  %v1708_v38 = vmul.f32 1.442695, %v1605_v12  ;;  %v3011_v17 = vld [vmem:[%s4546_s4 + $0x18] sm:$0xff]  }
 0x3d3   : > { %3154 = vpow2.f32 %v1704_v4  ;;  %1990 = vmatprep.mubr.bf16.mxu0 %v1869_v16  ;;  %1804 = vadd.xlane.f32.xlu1 %v1803_v35 }
 0x3d4   : > { %v3145_v9 = vpop.eup %3144  ;;  %3156 = vpow2.f32 %v1706_v1  ;;  %1991 = vmatmul.mubr.bf16.gmra.mrb[92].mxu0 %v1868_v33  ;;  %2876 = vmatprep.subr.bf16.mxu1 %v3011_v17 }
 0x3d5   : > { %v3147_v45 = vpop.eup %3146  ;;  %3158 = vpow2.f32 %v1708_v38  ;;  %v1532_v0 = vpop.xlane.xlu0 %1531  ;;  %2877 = vmatpush3.bf16.msra.mxu1 %v3011_v17  ;;  %v4579_v38 = vld [vmem:[#allocation10_spill] sm:$0xff] }
 0x3d6   : > { %v3149_v61 = vpop.eup %3148  ;;  %v1606_v50 = vsub.f32 %v4219_v20, %v1532_v0  ;;  %v1607_v25 = vsub.f32 %v4221_v27, %v1532_v0  ;;  %v1806_v13 = vadd.f32 %v3147_v45, %v3145_v9 }
 0x3d7   : > { %v3151_v30 = vpop.eup %3150  ;;  %v1535_v57 = vpop.xlane.xlu1 %1534  ;;  %v1870_v46 = vpack.c.bf16 %v3149_v61, %v3145_v9 }
 0x3d8   : > { %v1710_v60 = vmul.f32 1.442695, %v1606_v50  ;;  %v1712_v47 = vmul.f32 1.442695, %v1607_v25  ;;  %v1608_v18 = vsub.f32 %v4223_v54, %v1535_v57  ;;  %v1609_v37 = vsub.f32 %v4227_v2, %v1535_v57  ;;  %1807 = vadd.xlane.f32.xlu0 %v1806_v13 }
 0x3d9   : > { %v1871_v49 = vpack.c.bf16 %v3151_v30, %v3147_v45  ;;  %v1809_v10 = vadd.f32 %v3151_v30, %v3149_v61  ;;  %v4580_v45 = vld [vmem:[#allocation11_spill] sm:$0xff]  ;;  %v3012_v30 = vld [vmem:[%s4546_s4 + $0x20] sm:$0xff]  }
 0x3da   : > { %3160 = vpow2.f32 %v1710_v60  ;;  %v1714_v20 = vmul.f32 1.442695, %v1608_v18  ;;  %v1716_v27 = vmul.f32 1.442695, %v1609_v37  ;;  %v4581_v60 = vld [vmem:[#allocation12_spill] sm:$0xff]  ;;  %v4582_v18 = vld [vmem:[#allocation13_spill] sm:$0xff]  ;;  %2878 = vmatprep.subr.bf16.mxu1 %v3012_v30 }
 0x3db   : > { %3162 = vpow2.f32 %v1712_v47  ;;  %1998 = vmatprep.mubr.bf16.mxu0 %v1871_v49  ;;  %1810 = vadd.xlane.f32.xlu1 %v1809_v10 }
 0x3dc   : > { %v3153_v41 = vpop.eup %3152  ;;  %3164 = vpow2.f32 %v1714_v20  ;;  %1999 = vmatmul.mubr.bf16.gmra.mrb[96].mxu0 %v1870_v46  ;;  %2879 = vmatpush3.bf16.msra.mxu1 %v3012_v30 }
 0x3dd   : > { %v3155_v54 = vpop.eup %3154  ;;  %3166 = vpow2.f32 %v1716_v27  ;;  %v1538_v2 = vpop.xlane.xlu0 %1537  ;;  %v3013_v27 = vld [vmem:[%s4546_s4 + $0x28] sm:$0xff]  }
 0x3de   : > { %v3157_v24 = vpop.eup %3156  ;;  %v1610_v53 = vsub.f32 %v4231_v51, %v1538_v2  ;;  %v1611_v19 = vsub.f32 %v4233_v5, %v1538_v2  ;;  %v1812_v3 = vadd.f32 %v3155_v54, %v3153_v41  ;;  %2880 = vmatprep.subr.bf16.mxu1 %v3013_v27 }
 0x3df   : > { %v3159_v7 = vpop.eup %3158  ;;  %v1541_v23 = vpop.xlane.xlu1 %1540  ;;  %v1872_v29 = vpack.c.bf16 %v3157_v24, %v3153_v41 }
 0x3e0   : > { %v1718_v21 = vmul.f32 1.442695, %v1610_v53  ;;  %v1720_v28 = vmul.f32 1.442695, %v1611_v19  ;;  %v1612_v36 = vsub.f32 %v4235_v40, %v1541_v23  ;;  %v1613_v56 = vsub.f32 %v4239_v6, %v1541_v23  ;;  %1813 = vadd.xlane.f32.xlu0 %v1812_v3  ;;  %v4583_v53 = vld [vmem:[#allocation14_spill] sm:$0xff]  ;;  %v4584_v3 = vld [vmem:[#allocation15_spill] sm:$0xff]  ;;  %2881 = vmatpush3.bf16.msra.mxu1 %v3013_v27 }
 0x3e1   : > { %v1873_v55 = vpack.c.bf16 %v3159_v7, %v3155_v54  ;;  %v1815_v52 = vadd.f32 %v3159_v7, %v3157_v24 }
 0x3e2   : > { %3168 = vpow2.f32 %v1718_v21  ;;  %v1722_v26 = vmul.f32 1.442695, %v1612_v36  ;;  %v1724_v22 = vmul.f32 1.442695, %v1613_v56  ;;  %v3014_v36 = vld [vmem:[%s4546_s4 + $0x30] sm:$0xff]  }
 0x3e3   : > { %3170 = vpow2.f32 %v1720_v28  ;;  %2006 = vmatprep.mubr.bf16.mxu0 %v1873_v55  ;;  %1816 = vadd.xlane.f32.xlu1 %v1815_v52  ;;  %v4585_v52 = vld [vmem:[#allocation16_spill] sm:$0xff] }
 0x3e4   : > { %v3161_v51 = vpop.eup %3160  ;;  %3172 = vpow2.f32 %v1722_v26  ;;  %2007 = vmatmul.mubr.bf16.gmra.mrb[100].mxu0 %v1872_v29  ;;  %2882 = vmatprep.subr.bf16.mxu1 %v3014_v36 }
 0x3e5   : > { %v3163_v5 = vpop.eup %3162  ;;  %3174 = vpow2.f32 %v1724_v22  ;;  %v1544_v63 = vpop.xlane.xlu0 %1543  ;;  %v4586_v22 = vld [vmem:[#allocation17_spill] sm:$0xff]  ;;  %2883 = vmatpush3.bf16.msra.mxu1 %v3014_v36 }
 0x3e6   : > { %v3165_v58 = vpop.eup %3164  ;;  %v1614_v40 = vsub.f32 %v4243_v14, %v1544_v63  ;;  %v1615_v6 = vsub.f32 %v4245_v11, %v1544_v63  ;;  %v1818_v31 = vadd.f32 %v3163_v5, %v3161_v51 }
 0x3e7   : > { %v3167_v48 = vpop.eup %3166  ;;  %v1547_v15 = vpop.xlane.xlu1 %1546  ;;  %v1874_v59 = vpack.c.bf16 %v3165_v58, %v3161_v51 }
 0x3e8   : > { %v1726_v42 = vmul.f32 1.442695, %v1614_v40  ;;  %v1728_v44 = vmul.f32 1.442695, %v1615_v6  ;;  %v1616_v8 = vsub.f32 %v4577_v39, %v1547_v15  ;;  %v1617_v33 = vsub.f32 %v4578_v32, %v1547_v15  ;;  %1819 = vadd.xlane.f32.xlu0 %v1818_v31  ;;  %v3015_v6 = vld [vmem:[%s4546_s4 + $0x38] sm:$0xff]  }
 0x3e9   : > { %v1875_v34 = vpack.c.bf16 %v3167_v48, %v3163_v5  ;;  %v1821_v4 = vadd.f32 %v3167_v48, %v3165_v58  ;;  %2884 = vmatprep.subr.bf16.mxu1 %v3015_v6  ;;  %v4588_v39 = vld [vmem:[#allocation19_spill] sm:$0xff] }
 0x3ea   : > { %3176 = vpow2.f32 %v1726_v42  ;;  %v1730_v14 = vmul.f32 1.442695, %v1616_v8  ;;  %v1732_v11 = vmul.f32 1.442695, %v1617_v33  ;;  %v4587_v42 = vld [vmem:[#allocation18_spill] sm:$0xff]  ;;  %2885 = vmatpush3.bf16.msra.mxu1 %v3015_v6 }
 0x3eb   : > { %3178 = vpow2.f32 %v1728_v44  ;;  %2014 = vmatprep.mubr.bf16.mxu0 %v1875_v34  ;;  %1822 = vadd.xlane.f32.xlu1 %v1821_v4 }
 0x3ec   : > { %v3169_v12 = vpop.eup %3168  ;;  %3180 = vpow2.f32 %v1730_v14  ;;  %2015 = vmatmul.mubr.bf16.gmra.mrb[104].mxu0 %v1874_v59 }
 0x3ed   : > { %v3171_v16 = vpop.eup %3170  ;;  %3182 = vpow2.f32 %v1732_v11  ;;  %v1550_v35 = vpop.xlane.xlu0 %1549 }
 0x3ee   : > { %v3173_v1 = vpop.eup %3172  ;;  %v1618_v9 = vsub.f32 %v4579_v38, %v1550_v35  ;;  %v1619_v0 = vsub.f32 %v4580_v45, %v1550_v35  ;;  %v1824_v61 = vadd.f32 %v3171_v16, %v3169_v12 }
 0x3ef   : > { %v3175_v50 = vpop.eup %3174  ;;  %v1553_v25 = vpop.xlane.xlu1 %1552  ;;  %v1876_v13 = vpack.c.bf16 %v3173_v1, %v3169_v12  ;;  %v4589_v12 = vld [vmem:[#allocation20_spill] sm:$0xff] }
 0x3f0   : > { %v1734_v57 = vmul.f32 1.442695, %v1618_v9  ;;  %v1736_v46 = vmul.f32 1.442695, %v1619_v0  ;;  %v1620_v47 = vsub.f32 %v4581_v60, %v1553_v25  ;;  %v1621_v37 = vsub.f32 %v4582_v18, %v1553_v25  ;;  %1825 = vadd.xlane.f32.xlu0 %v1824_v61 }
 0x3f1   : > { %v1877_v49 = vpack.c.bf16 %v3175_v50, %v3171_v16  ;;  %v1827_v10 = vadd.f32 %v3175_v50, %v3173_v1 }
 0x3f2   : > { %3184 = vpow2.f32 %v1734_v57  ;;  %v1738_v43 = vmul.f32 1.442695, %v1620_v47  ;;  %v1740_v20 = vmul.f32 1.442695, %v1621_v37 }
 0x3f3   : > { %3186 = vpow2.f32 %v1736_v46  ;;  %2022 = vmatprep.mubr.bf16.mxu0 %v1877_v49  ;;  %1828 = vadd.xlane.f32.xlu1 %v1827_v10 }
 0x3f4   : > { %v3177_v41 = vpop.eup %3176  ;;  %3188 = vpow2.f32 %v1738_v43  ;;  %2023 = vmatmul.mubr.bf16.gmra.mrb[108].mxu0 %v1876_v13 }
 0x3f5   : > { %v3179_v54 = vpop.eup %3178  ;;  %3190 = vpow2.f32 %v1740_v20  ;;  %v1556_v2 = vpop.xlane.xlu0 %1555 }
 0x3f6   : > { %v3181_v24 = vpop.eup %3180  ;;  %v1622_v19 = vsub.f32 %v4583_v53, %v1556_v2  ;;  %v1623_v7 = vsub.f32 %v4584_v3, %v1556_v2  ;;  %v1830_v23 = vadd.f32 %v3179_v54, %v3177_v41 }
 0x3f7   : > { %v3183_v29 = vpop.eup %3182  ;;  %v1559_v21 = vpop.xlane.xlu1 %1558  ;;  %v1878_v28 = vpack.c.bf16 %v3181_v24, %v3177_v41 }
 0x3f8   : > { %v1742_v56 = vmul.f32 1.442695, %v1622_v19  ;;  %v1744_v55 = vmul.f32 1.442695, %v1623_v7  ;;  %v1624_v26 = vsub.f32 %v4585_v52, %v1559_v21  ;;  %v1625_v51 = vsub.f32 %v4586_v22, %v1559_v21  ;;  %1831 = vadd.xlane.f32.xlu0 %v1830_v23 }
 0x3f9   : > { %v1879_v5 = vpack.c.bf16 %v3183_v29, %v3179_v54  ;;  %v1833_v63 = vadd.f32 %v3183_v29, %v3181_v24 }
 0x3fa   : > { %3192 = vpow2.f32 %v1742_v56  ;;  %v1746_v58 = vmul.f32 1.442695, %v1624_v26  ;;  %v1748_v40 = vmul.f32 1.442695, %v1625_v51 }
 0x3fb   : > { %3194 = vpow2.f32 %v1744_v55  ;;  %2030 = vmatprep.mubr.bf16.mxu0 %v1879_v5  ;;  %1834 = vadd.xlane.f32.xlu1 %v1833_v63 }
 0x3fc   : > { %v3185_v31 = vpop.eup %3184  ;;  %3196 = vpow2.f32 %v1746_v58  ;;  %2031 = vmatmul.mubr.bf16.gmra.mrb[112].mxu0 %v1878_v28 }
 0x3fd   : > { %v3187_v48 = vpop.eup %3186  ;;  %3198 = vpow2.f32 %v1748_v40  ;;  %v1562_v15 = vpop.xlane.xlu0 %1561 }
 0x3fe   : > { %v3189_v59 = vpop.eup %3188  ;;  %v1626_v44 = vsub.f32 %v4587_v42, %v1562_v15  ;;  %v1627_v8 = vsub.f32 %v4588_v39, %v1562_v15  ;;  %v1836_v32 = vadd.f32 %v3187_v48, %v3185_v31 }
 0x3ff   : > { %v3191_v33 = vpop.eup %3190  ;;  %v1565_v34 = vpop.xlane.xlu1 %1564  ;;  %v1880_v4 = vpack.c.bf16 %v3189_v59, %v3185_v31 }
 0x400   : > { %v1750_v17 = vmul.f32 1.442695, %v1626_v44  ;;  %v1752_v14 = vmul.f32 1.442695, %v1627_v8  ;;  %1837 = vadd.xlane.f32.xlu0 %v1836_v32  ;;  %v1628_v11 = vsub.f32 %v4283_v62, %v1565_v34  ;;  %v1629_v16 = vsub.f32 %v4589_v12, %v1565_v34 }
 0x401   : > { %v1881_v35 = vpack.c.bf16 %v3191_v33, %v3187_v48  ;;  %v1839_v1 = vadd.f32 %v3191_v33, %v3189_v59 }
 0x402   : > { %3200 = vpow2.f32 %v1750_v17  ;;  %v1754_v38 = vmul.f32 1.442695, %v1628_v11  ;;  %v1756_v9 = vmul.f32 1.442695, %v1629_v16 }
 0x403   : > { %3202 = vpow2.f32 %v1752_v14  ;;  %2038 = vmatprep.mubr.bf16.mxu0 %v1881_v35  ;;  %1840 = vadd.xlane.f32.xlu1 %v1839_v1 }
 0x404   : > { %v3193_v45 = vpop.eup %3192  ;;  %3204 = vpow2.f32 %v1754_v38  ;;  %2039 = vmatmul.mubr.bf16.gmra.mrb[116].mxu0 %v1880_v4 }
 0x405   : > { %v3195_v0 = vpop.eup %3194  ;;  %3206 = vpow2.f32 %v1756_v9 }
 0x406   : > { %v3197_v61 = vpop.eup %3196  ;;  %v1842_v50 = vadd.f32 %v3195_v0, %v3193_v45 }
 0x407   : > { %v3199_v25 = vpop.eup %3198  ;;  %v1882_v13 = vpack.c.bf16 %v3197_v61, %v3193_v45 }
 0x408   : > { %1843 = vadd.xlane.f32.xlu0 %v1842_v50  ;;  %v1883_v62 = vpack.c.bf16 %v3199_v25, %v3195_v0  ;;  %v1845_v30 = vadd.f32 %v3199_v25, %v3197_v61 }
 0x40a   : > { %2046 = vmatprep.mubr.bf16.mxu0 %v1883_v62  ;;  %1846 = vadd.xlane.f32.xlu1 %v1845_v30 }
 0x40c   : > { %v3201_v57 = vpop.eup %3200  ;;  %2047 = vmatmul.mubr.bf16.gmra.mrb[120].mxu0 %v1882_v13 }
 0x40d   : > { %v3203_v46 = vpop.eup %3202 }
 0x40e   : > { %v3205_v60 = vpop.eup %3204  ;;  %v1848_v47 = vadd.f32 %v3203_v46, %v3201_v57 }
 0x40f   : > { %v3207_v18 = vpop.eup %3206  ;;  %v1884_v37 = vpack.c.bf16 %v3205_v60, %v3201_v57 }
 0x410   : > { %1849 = vadd.xlane.f32.xlu0 %v1848_v47  ;;  %v1885_v49 = vpack.c.bf16 %v3207_v18, %v3203_v46  ;;  %v1851_v10 = vadd.f32 %v3207_v18, %v3205_v60 }
 0x412   : > { %2054 = vmatprep.mubr.bf16.mxu0 %v1885_v49  ;;  %1852 = vadd.xlane.f32.xlu1 %v1851_v10 }
 0x414   : > { %2055 = vmatmul.mubr.bf16.gmra.mrb[124].mxu0 %v1884_v37 }
 0x425   : > { %v1760_v43 = vpop.xlane.xlu0 %1759 }
 0x426   : > { %3208 = vrcp.f32 %v1760_v43 }
 0x428   : > { %v1763_v20 = vpop.xlane.xlu1 %1762 }
 0x429   : > { %3210 = vrcp.f32 %v1763_v20 }
 0x42d   : > { %v1766_v27 = vpop.xlane.xlu0 %1765 }
 0x42e   : > { %3212 = vrcp.f32 %v1766_v27 }
 0x430   : > { %v1769_v41 = vpop.xlane.xlu1 %1768  ;;  %v3209_v3 = vpop.eup %3208 }
 0x431   : > { %3214 = vrcp.f32 %v1769_v41 }
 0x433   : > { %v3211_v23 = vpop.eup %3210 }
 0x435   : > { %v1772_v28 = vpop.xlane.xlu0 %1771 }
 0x436   : > { %3216 = vrcp.f32 %v1772_v28 }
 0x438   : > { %v1775_v36 = vpop.xlane.xlu1 %1774  ;;  %v3213_v5 = vpop.eup %3212 }
 0x439   : > { %3218 = vrcp.f32 %v1775_v36 }
 0x43b   : > { %v3215_v58 = vpop.eup %3214 }
 0x43d   : > { %v1778_v31 = vpop.xlane.xlu0 %1777 }
 0x43e   : > { %3220 = vrcp.f32 %v1778_v31 }
 0x440   : > { %v1781_v48 = vpop.xlane.xlu1 %1780  ;;  %v3217_v32 = vpop.eup %3216 }
 0x441   : > { %3222 = vrcp.f32 %v1781_v48 }
 0x443   : > { %v3219_v34 = vpop.eup %3218 }
 0x445   : > { %v1784_v14 = vpop.xlane.xlu0 %1783 }
 0x446   : > { %3224 = vrcp.f32 %v1784_v14 }
 0x448   : > { %v1787_v11 = vpop.xlane.xlu1 %1786  ;;  %v3221_v45 = vpop.eup %3220 }
 0x449   : > { %3226 = vrcp.f32 %v1787_v11 }
 0x44b   : > { %v3223_v61 = vpop.eup %3222 }
 0x44d   : > { %v1790_v13 = vpop.xlane.xlu0 %1789 }
 0x44e   : > { %3228 = vrcp.f32 %v1790_v13 }
 0x450   : > { %v1793_v62 = vpop.xlane.xlu1 %1792  ;;  %v3225_v37 = vpop.eup %3224 }
 0x451   : > { %3230 = vrcp.f32 %v1793_v62 }
 0x453   : > { %v3227_v10 = vpop.eup %3226 }
 0x455   : > { %v1796_v27 = vpop.xlane.xlu0 %1795 }
 0x456   : > { %3232 = vrcp.f32 %v1796_v27 }
 0x458   : > { %v1799_v41 = vpop.xlane.xlu1 %1798 }
 0x459   : > { %3234 = vrcp.f32 %v1799_v41 }
 0x45d   : > { %v1802_v36 = vpop.xlane.xlu0 %1801 }
 0x45e   : > { %3236 = vrcp.f32 %v1802_v36 }
 0x465   : > { %v1808_v48 = vpop.xlane.xlu0 %1807 }
 0x46d   : > { %v1814_v11 = vpop.xlane.xlu0 %1813 }
 0x46f   : > { %v2702_v54 = vpop.f32.mrb[64].mxu0 }
 0x470   : > { %v2703_v2 = vpop.f32.mrb[65].mxu0 }
 0x471   : > { %v2704_v24 = vadd.f32 %v2703_v2, %v2702_v54  ;;  %v2705_v53 = vpop.f32.mrb[66].mxu0 }
 0x472   : > { %v2706_v19 = vpop.f32.mrb[67].mxu0 }
 0x473   : > { %v2707_v7 = vadd.f32 %v2706_v19, %v2705_v53  ;;  %v2095_v29 = vmul.f32 %v3209_v3, %v2704_v24 }
 0x475   : > { %v2096_v21 = vmul.f32 %v3211_v23, %v2707_v7  ;;  %v3229_v7 = vpop.eup %3228  ;;  %v1820_v62 = vpop.xlane.xlu0 %1819 }
 0x477   : > { %v2708_v56 = vpop.f32.mrb[68].mxu0  ;;  %v2160_v55 = vpack.c.bf16 %v2096_v21, %v2095_v29  ;;  %v3231_v29 = vpop.eup %3230 }
 0x478   : > { %v2709_v52 = vpop.f32.mrb[69].mxu0 }
 0x479   : > { %v2710_v26 = vadd.f32 %v2709_v52, %v2708_v56  ;;  %v2711_v22 = vpop.f32.mrb[70].mxu0  ;;  %2886 = vmatprep.mubr.bf16.mxu1 %v2160_v55  ;;  %v1805_v56 = vpop.xlane.xlu1 %1804 }
 0x47a   : > { %v2712_v51 = vpop.f32.mrb[71].mxu0  ;;  %3238 = vrcp.f32 %v1805_v56 }
 0x47b   : > { %v2713_v63 = vadd.f32 %v2712_v51, %v2711_v22  ;;  %v2097_v40 = vmul.f32 %v3213_v5, %v2710_v26  ;;  %3240 = vrcp.f32 %v1808_v48 }
 0x47d   : > { %v2098_v6 = vmul.f32 %v3215_v58, %v2713_v63  ;;  %v3233_v63 = vpop.eup %3232  ;;  %v1826_v41 = vpop.xlane.xlu0 %1825 }
 0x47f   : > { %v2161_v15 = vpack.c.bf16 %v2098_v6, %v2097_v40  ;;  %v2714_v59 = vpop.f32.mrb[72].mxu0  ;;  %v3235_v40 = vpop.eup %3234 }
 0x480   : > { %v2715_v42 = vpop.f32.mrb[73].mxu0 }
 0x481   : > { %v2716_v44 = vadd.f32 %v2715_v42, %v2714_v59  ;;  %v2717_v39 = vpop.f32.mrb[74].mxu0  ;;  %2887 = vmatmul.mubr.bf16.vlgmr.msra.gmra.mrb[96].mxu1 %v2161_v15  ;;  %v1811_v15 = vpop.xlane.xlu1 %1810 }
 0x482   : > { %v2718_v8 = vpop.f32.mrb[75].mxu0  ;;  %3242 = vrcp.f32 %v1811_v15 }
 0x483   : > { %v2719_v33 = vadd.f32 %v2718_v8, %v2717_v39  ;;  %v2099_v4 = vmul.f32 %v3217_v32, %v2716_v44  ;;  %3244 = vrcp.f32 %v1814_v11 }
 0x485   : > { %v2100_v17 = vmul.f32 %v3219_v34, %v2719_v33  ;;  %v3237_v33 = vpop.eup %3236  ;;  %v1832_v56 = vpop.xlane.xlu0 %1831 }
 0x487   : > { %v2720_v12 = vpop.f32.mrb[76].mxu0  ;;  %v2162_v16 = vpack.c.bf16 %v2100_v17, %v2099_v4  ;;  %v3239_v4 = vpop.eup %3238 }
 0x488   : > { %v2721_v35 = vpop.f32.mrb[77].mxu0 }
 0x489   : > { %v2722_v1 = vadd.f32 %v2721_v35, %v2720_v12  ;;  %v2723_v38 = vpop.f32.mrb[78].mxu0  ;;  %2890 = vmatprep.mubr.bf16.mxu1 %v2162_v16  ;;  %v1817_v12 = vpop.xlane.xlu1 %1816 }
 0x48a   : > { %v2724_v9 = vpop.f32.mrb[79].mxu0  ;;  %3246 = vrcp.f32 %v1817_v12 }
 0x48b   : > { %v2725_v0 = vadd.f32 %v2724_v9, %v2723_v38  ;;  %v2101_v50 = vmul.f32 %v3221_v45, %v2722_v1  ;;  %3248 = vrcp.f32 %v1820_v62 }
 0x48d   : > { %v2102_v25 = vmul.f32 %v3223_v61, %v2725_v0  ;;  %v3241_v0 = vpop.eup %3240  ;;  %v1838_v15 = vpop.xlane.xlu0 %1837 }
 0x48f   : > { %v2726_v30 = vpop.f32.mrb[80].mxu0  ;;  %v2163_v57 = vpack.c.bf16 %v2102_v25, %v2101_v50  ;;  %v3243_v50 = vpop.eup %3242 }
 0x490   : > { %v2727_v46 = vpop.f32.mrb[81].mxu0 }
 0x491   : > { %v2728_v60 = vadd.f32 %v2727_v46, %v2726_v30  ;;  %v2729_v47 = vpop.f32.mrb[82].mxu0  ;;  %2891 = vmatmul.mubr.bf16.gmra.mrb[100].mxu1 %v2163_v57  ;;  %v1823_v30 = vpop.xlane.xlu1 %1822 }
 0x492   : > { %v2730_v18 = vpop.f32.mrb[83].mxu0  ;;  %3250 = vrcp.f32 %v1823_v30 }
 0x493   : > { %v2731_v49 = vadd.f32 %v2730_v18, %v2729_v47  ;;  %v2103_v43 = vmul.f32 %v3225_v37, %v2728_v60  ;;  %3252 = vrcp.f32 %v1826_v41 }
 0x495   : > { %v2104_v20 = vmul.f32 %v3227_v10, %v2731_v49  ;;  %v3245_v49 = vpop.eup %3244  ;;  %v1844_v12 = vpop.xlane.xlu0 %1843 }
 0x497   : > { %v2732_v54 = vpop.f32.mrb[84].mxu0  ;;  %v2164_v2 = vpack.c.bf16 %v2104_v20, %v2103_v43  ;;  %v3247_v43 = vpop.eup %3246 }
 0x498   : > { %v2733_v24 = vpop.f32.mrb[85].mxu0 }
 0x499   : > { %v2734_v53 = vadd.f32 %v2733_v24, %v2732_v54  ;;  %v2735_v19 = vpop.f32.mrb[86].mxu0  ;;  %2894 = vmatprep.mubr.bf16.mxu1 %v2164_v2  ;;  %v1829_v54 = vpop.xlane.xlu1 %1828 }
 0x49a   : > { %v2736_v3 = vpop.f32.mrb[87].mxu0  ;;  %3254 = vrcp.f32 %v1829_v54 }
 0x49b   : > { %v2737_v23 = vadd.f32 %v2736_v3, %v2735_v19  ;;  %v2105_v21 = vmul.f32 %v3229_v7, %v2734_v53  ;;  %3256 = vrcp.f32 %v1832_v56  ;;  %v4383_v56 = vld [vmem:[%s4547_s5] ss:$0 sm:$0xff] }
 0x49d   : > { %v2106_v28 = vmul.f32 %v3231_v29, %v2737_v23  ;;  %v3249_v23 = vpop.eup %3248  ;;  %v1850_v30 = vpop.xlane.xlu0 %1849 }
 0x49f   : > { %v2738_v55 = vpop.f32.mrb[88].mxu0  ;;  %v2165_v52 = vpack.c.bf16 %v2106_v28, %v2105_v21  ;;  %v3251_v21 = vpop.eup %3250 }
 0x4a0   : > { %v2739_v26 = vpop.f32.mrb[89].mxu0 }
 0x4a1   : > { %v2740_v22 = vadd.f32 %v2739_v26, %v2738_v55  ;;  %v2741_v51 = vpop.f32.mrb[90].mxu0  ;;  %2895 = vmatmul.mubr.bf16.gmra.mrb[104].mxu1 %v2165_v52  ;;  %v1835_v55 = vpop.xlane.xlu1 %1834 }
 0x4a2   : > { %v2742_v5 = vpop.f32.mrb[91].mxu0  ;;  %3258 = vrcp.f32 %v1835_v55  ;;  %v2130_v55 = vld [vmem:[%s3469_s13 + $0x10] sm:$0xff] }
 0x4a3   : > { %v2743_v58 = vadd.f32 %v2742_v5, %v2741_v51  ;;  %v2107_v6 = vmul.f32 %v3233_v63, %v2740_v22  ;;  %3260 = vrcp.f32 %v1838_v15 }
 0x4a5   : > { %v2108_v31 = vmul.f32 %v3235_v40, %v2743_v58  ;;  %v3253_v58 = vpop.eup %3252 }
 0x4a7   : > { %v2744_v59 = vpop.f32.mrb[92].mxu0  ;;  %v2166_v42 = vpack.c.bf16 %v2108_v31, %v2107_v6  ;;  %v3255_v6 = vpop.eup %3254 }
 0x4a8   : > { %v2745_v44 = vpop.f32.mrb[93].mxu0 }
 0x4a9   : > { %v2746_v39 = vadd.f32 %v2745_v44, %v2744_v59  ;;  %v2747_v8 = vpop.f32.mrb[94].mxu0  ;;  %2898 = vmatprep.mubr.bf16.mxu1 %v2166_v42  ;;  %v1841_v59 = vpop.xlane.xlu1 %1840 }
 0x4aa   : > { %v2748_v32 = vpop.f32.mrb[95].mxu0  ;;  %3262 = vrcp.f32 %v1841_v59 }
 0x4ab   : > { %v2749_v34 = vadd.f32 %v2748_v32, %v2747_v8  ;;  %v2109_v17 = vmul.f32 %v3237_v33, %v2746_v39  ;;  %3264 = vrcp.f32 %v1844_v12 }
 0x4ad   : > { %v2110_v14 = vmul.f32 %v3239_v4, %v2749_v34  ;;  %v3257_v34 = vpop.eup %3256 }
 0x4af   : > { %v2750_v16 = vpop.f32.mrb[96].mxu0  ;;  %v2167_v35 = vpack.c.bf16 %v2110_v14, %v2109_v17  ;;  %v3259_v17 = vpop.eup %3258 }
 0x4b0   : > { %v2751_v1 = vpop.f32.mrb[97].mxu0 }
 0x4b1   : > { %v2752_v38 = vadd.f32 %v2751_v1, %v2750_v16  ;;  %v2753_v9 = vpop.f32.mrb[98].mxu0  ;;  %2899 = vmatmul.mubr.bf16.gmra.mrb[108].mxu1 %v2167_v35  ;;  %v1847_v16 = vpop.xlane.xlu1 %1846 }
 0x4b2   : > { %v2754_v45 = vpop.f32.mrb[99].mxu0  ;;  %3266 = vrcp.f32 %v1847_v16  ;;  %v2133_v16 = vld [vmem:[%s3469_s13 + $0x28] sm:$0xff] }
 0x4b3   : > { %v2755_v61 = vadd.f32 %v2754_v45, %v2753_v9  ;;  %v2111_v25 = vmul.f32 %v3241_v0, %v2752_v38  ;;  %3268 = vrcp.f32 %v1850_v30  ;;  %v2139_v30 = vld [vmem:[%s3469_s13 + $0x58] sm:$0xff] }
 0x4b5   : > { %v2112_v13 = vmul.f32 %v3243_v50, %v2755_v61  ;;  %v3261_v61 = vpop.eup %3260 }
 0x4b7   : > { %v2756_v57 = vpop.f32.mrb[100].mxu0  ;;  %v2168_v46 = vpack.c.bf16 %v2112_v13, %v2111_v25  ;;  %v3263_v25 = vpop.eup %3262 }
 0x4b8   : > { %v2757_v60 = vpop.f32.mrb[101].mxu0 }
 0x4b9   : > { %v2758_v47 = vadd.f32 %v2757_v60, %v2756_v57  ;;  %v2759_v18 = vpop.f32.mrb[102].mxu0  ;;  %2902 = vmatprep.mubr.bf16.mxu1 %v2168_v46  ;;  %v1853_v57 = vpop.xlane.xlu1 %1852 }
 0x4ba   : > { %v2760_v37 = vpop.f32.mrb[103].mxu0  ;;  %3270 = vrcp.f32 %v1853_v57 }
 0x4bb   : > { %v2761_v10 = vadd.f32 %v2760_v37, %v2759_v18  ;;  %v2113_v20 = vmul.f32 %v3245_v49, %v2758_v47 }
 0x4bd   : > { %v2114_v27 = vmul.f32 %v3247_v43, %v2761_v10  ;;  %v3265_v10 = vpop.eup %3264 }
 0x4bf   : > { %v2762_v2 = vpop.f32.mrb[104].mxu0  ;;  %v2169_v24 = vpack.c.bf16 %v2114_v27, %v2113_v20  ;;  %v3267_v20 = vpop.eup %3266 }
 0x4c0   : > { %v2763_v53 = vpop.f32.mrb[105].mxu0 }
 0x4c1   : > { %v2764_v19 = vadd.f32 %v2763_v53, %v2762_v2  ;;  %v2765_v3 = vpop.f32.mrb[106].mxu0  ;;  %2903 = vmatmul.mubr.bf16.gmra.mrb[112].mxu1 %v2169_v24 }
 0x4c2   : > { %v2766_v7 = vpop.f32.mrb[107].mxu0 }
 0x4c3   : > { %v2767_v29 = vadd.f32 %v2766_v7, %v2765_v3  ;;  %v2115_v28 = vmul.f32 %v3249_v23, %v2764_v19  ;;  %v3269_v7 = vpop.eup %3268 }
 0x4c5   : > { %v2116_v36 = vmul.f32 %v3251_v21, %v2767_v29  ;;  %v3271_v29 = vpop.eup %3270 }
 0x4c7   : > { %v2768_v52 = vpop.f32.mrb[108].mxu0  ;;  %v2170_v26 = vpack.c.bf16 %v2116_v36, %v2115_v28 }
 0x4c8   : > { %v2769_v22 = vpop.f32.mrb[109].mxu0 }
 0x4c9   : > { %v2770_v51 = vadd.f32 %v2769_v22, %v2768_v52  ;;  %v2771_v5 = vpop.f32.mrb[110].mxu0  ;;  %2906 = vmatprep.mubr.bf16.mxu1 %v2170_v26  ;;  %v2128_v22 = vld [vmem:[%s3469_s13] sm:$0xff] }
 0x4ca   : > { %v2772_v63 = vpop.f32.mrb[111].mxu0 }
 0x4cb   : > { %v2773_v40 = vadd.f32 %v2772_v63, %v2771_v5  ;;  %v2117_v31 = vmul.f32 %v3253_v58, %v2770_v51  ;;  %v2131_v63 = vld [vmem:[%s3469_s13 + $0x18] sm:$0xff] }
 0x4cd   : > { %v2118_v48 = vmul.f32 %v3255_v6, %v2773_v40 }
 0x4cf   : > { %v2774_v42 = vpop.f32.mrb[112].mxu0  ;;  %v2171_v44 = vpack.c.bf16 %v2118_v48, %v2117_v31  ;;  %v2129_v31 = vld [vmem:[%s3469_s13 + $0x8] sm:$0xff] }
 0x4d0   : > { %v2775_v39 = vpop.f32.mrb[113].mxu0 }
 0x4d1   : > { %v2776_v8 = vadd.f32 %v2775_v39, %v2774_v42  ;;  %v2777_v32 = vpop.f32.mrb[114].mxu0  ;;  %2907 = vmatmul.mubr.bf16.gmra.mrb[116].mxu1 %v2171_v44  ;;  %v2134_v39 = vld [vmem:[%s3469_s13 + $0x30] sm:$0xff] }
 0x4d2   : > { %v2778_v33 = vpop.f32.mrb[115].mxu0 }
 0x4d3   : > { %v2779_v4 = vadd.f32 %v2778_v33, %v2777_v32  ;;  %v2119_v14 = vmul.f32 %v3257_v34, %v2776_v8  ;;  %v2132_v33 = vld [vmem:[%s3469_s13 + $0x20] sm:$0xff] }
 0x4d5   : > { %v2120_v11 = vmul.f32 %v3259_v17, %v2779_v4  ;;  %v2135_v17 = vld [vmem:[%s3469_s13 + $0x38] sm:$0xff] }
 0x4d7   : > { %v2780_v35 = vpop.f32.mrb[116].mxu0  ;;  %v2172_v1 = vpack.c.bf16 %v2120_v11, %v2119_v14 }
 0x4d8   : > { %v2781_v38 = vpop.f32.mrb[117].mxu0 }
 0x4d9   : > { %v2782_v9 = vadd.f32 %v2781_v38, %v2780_v35  ;;  %v2783_v45 = vpop.f32.mrb[118].mxu0  ;;  %2910 = vmatprep.mubr.bf16.mxu1 %v2172_v1 }
 0x4da   : > { %v2784_v0 = vpop.f32.mrb[119].mxu0 }
 0x4db   : > { %v2785_v50 = vadd.f32 %v2784_v0, %v2783_v45  ;;  %v2121_v13 = vmul.f32 %v3261_v61, %v2782_v9  ;;  %v2138_v0 = vld [vmem:[%s3469_s13 + $0x50] sm:$0xff] }
 0x4dd   : > { %v2122_v62 = vmul.f32 %v3263_v25, %v2785_v50  ;;  %v2136_v25 = vld [vmem:[%s3469_s13 + $0x40] sm:$0xff] }
 0x4df   : > { %v2786_v46 = vpop.f32.mrb[120].mxu0  ;;  %v2173_v60 = vpack.c.bf16 %v2122_v62, %v2121_v13 }
 0x4e0   : > { %v2787_v47 = vpop.f32.mrb[121].mxu0 }
 0x4e1   : > { %v2788_v18 = vadd.f32 %v2787_v47, %v2786_v46  ;;  %v2789_v37 = vpop.f32.mrb[122].mxu0  ;;  %2911 = vmatmul.mubr.bf16.gmra.mrb[120].mxu1 %v2173_v60  ;;  %v2137_v47 = vld [vmem:[%s3469_s13 + $0x48] sm:$0xff] }
 0x4e2   : > { %v2790_v49 = vpop.f32.mrb[123].mxu0 }
 0x4e3   : > { %v2791_v43 = vadd.f32 %v2790_v49, %v2789_v37  ;;  %v2123_v27 = vmul.f32 %v3265_v10, %v2788_v18 }
 0x4e5   : > { %v2124_v41 = vmul.f32 %v3267_v20, %v2791_v43  ;;  %v2142_v20 = vld [vmem:[%s3469_s13 + $0x70] sm:$0xff] }
 0x4e7   : > { %v2792_v54 = vpop.f32.mrb[124].mxu0  ;;  %v2174_v2 = vpack.c.bf16 %v2124_v41, %v2123_v27 }
 0x4e8   : > { %v2793_v24 = vpop.f32.mrb[125].mxu0 }
 0x4e9   : > { %v2794_v53 = vadd.f32 %v2793_v24, %v2792_v54  ;;  %v2795_v19 = vpop.f32.mrb[126].mxu0  ;;  %2914 = vmatprep.mubr.bf16.mxu1 %v2174_v2  ;;  %v2140_v54 = vld [vmem:[%s3469_s13 + $0x60] sm:$0xff] }
 0x4ea   : > { %v2796_v3 = vpop.f32.mrb[127].mxu0 }
 0x4eb   : > { %v2797_v23 = vadd.f32 %v2796_v3, %v2795_v19  ;;  %v2125_v21 = vmul.f32 %v3269_v7, %v2794_v53  ;;  %v2143_v53 = vld [vmem:[%s3469_s13 + $0x78] sm:$0xff] }
 0x4ed   : > { %v2126_v28 = vmul.f32 %v3271_v29, %v2797_v23  ;;  %v2141_v23 = vld [vmem:[%s3469_s13 + $0x68] sm:$0xff] }
 0x4ef   : > { %v2175_v36 = vpack.c.bf16 %v2126_v28, %v2125_v21 }
 0x4f1   : > { %2915 = vmatmul.mubr.bf16.gmra.mrb[124].mxu1 %v2175_v36 }
 0x554   : > { %v2888_v52 = vpop.f32.mrb[96].mxu1 }
 0x555   : > { %v2290_v26 = vadd.f32 %v2888_v52, %v4383_v56  ;;  %v2281_v51 = vpop.f32.mrb[97].mxu1  ;;  %v2146_v52 = vld [vmem:[%s3469_s13 + $0x90] sm:$0xff] }
 0x556   : > { %v2282_v5 = vadd.f32 %v4383_v56, %v2281_v51  ;;  %v2889_v58 = vpop.f32.mrb[98].mxu1  ;;  %v2144_v51 = vld [vmem:[%s3469_s13 + $0x80] sm:$0xff] }
 0x557   : > { %v2410_v40 = vadd.f32 %v2290_v26, %v2130_v55  ;;  %v2293_v6 = vadd.f32 %v2889_v58, %v4383_v56  ;;  %v2284_v48 = vpop.f32.mrb[99].mxu1  ;;  %v2147_v58 = vld [vmem:[%s3469_s13 + $0x98] sm:$0xff] }
 0x558   : > { %v2408_v15 = vadd.f32 %v2282_v5, %v2128_v22  ;;  %v2285_v59 = vadd.f32 %v4383_v56, %v2284_v48  ;;  %v2145_v48 = vld [vmem:[%s3469_s13 + $0x88] sm:$0xff] }
 0x559   : > { %2442 = vst [vmem:[%s4395_s28 + $0x10] sm:$0xff] %v2410_v40  ;;  %v2411_v42 = vadd.f32 %v2293_v6, %v2131_v63 }
 0x55a   : > { %2440 = vst [vmem:[%s4395_s28] sm:$0xff] %v2408_v15  ;;  %v2409_v44 = vadd.f32 %v2285_v59, %v2129_v31 }
 0x55b   : > { %2443 = vst [vmem:[%s4395_s28 + $0x18] sm:$0xff] %v2411_v42 }
 0x55c   : > { %2441 = vst [vmem:[%s4395_s28 + $0x8] sm:$0xff] %v2409_v44 }
 0x564   : > { %v2892_v8 = vpop.f32.mrb[100].mxu1 }
 0x565   : > { %v2306_v32 = vadd.f32 %v2892_v8, %v4383_v56  ;;  %v2297_v34 = vpop.f32.mrb[101].mxu1  ;;  %v2150_v8 = vld [vmem:[%s3469_s13 + $0xb0] sm:$0xff] }
 0x566   : > { %v2298_v4 = vadd.f32 %v4383_v56, %v2297_v34  ;;  %v2893_v14 = vpop.f32.mrb[102].mxu1  ;;  %v2148_v34 = vld [vmem:[%s3469_s13 + $0xa0] sm:$0xff] }
 0x567   : > { %v2414_v11 = vadd.f32 %v2306_v32, %v2134_v39  ;;  %v2309_v12 = vadd.f32 %v2893_v14, %v4383_v56  ;;  %v2300_v35 = vpop.f32.mrb[103].mxu1  ;;  %v2151_v14 = vld [vmem:[%s3469_s13 + $0xb8] sm:$0xff] }
 0x568   : > { %v2412_v1 = vadd.f32 %v2298_v4, %v2132_v33  ;;  %v2301_v38 = vadd.f32 %v4383_v56, %v2300_v35  ;;  %v2149_v35 = vld [vmem:[%s3469_s13 + $0xa8] sm:$0xff] }
 0x569   : > { %2446 = vst [vmem:[%s4395_s28 + $0x30] sm:$0xff] %v2414_v11  ;;  %v2415_v9 = vadd.f32 %v2309_v12, %v2135_v17 }
 0x56a   : > { %2444 = vst [vmem:[%s4395_s28 + $0x20] sm:$0xff] %v2412_v1  ;;  %v2413_v45 = vadd.f32 %v2301_v38, %v2133_v16 }
 0x56b   : > { %2447 = vst [vmem:[%s4395_s28 + $0x38] sm:$0xff] %v2415_v9 }
 0x56c   : > { %2445 = vst [vmem:[%s4395_s28 + $0x28] sm:$0xff] %v2413_v45 }
 0x574   : > { %v2896_v61 = vpop.f32.mrb[104].mxu1 }
 0x575   : > { %v2322_v50 = vadd.f32 %v2896_v61, %v4383_v56  ;;  %v2313_v13 = vpop.f32.mrb[105].mxu1  ;;  %v2154_v61 = vld [vmem:[%s3469_s13 + $0xd0] sm:$0xff] }
 0x576   : > { %v2314_v62 = vadd.f32 %v4383_v56, %v2313_v13  ;;  %v2897_v57 = vpop.f32.mrb[106].mxu1  ;;  %v2152_v13 = vld [vmem:[%s3469_s13 + $0xc0] sm:$0xff] }
 0x577   : > { %v2418_v46 = vadd.f32 %v2322_v50, %v2138_v0  ;;  %v2325_v60 = vadd.f32 %v2897_v57, %v4383_v56  ;;  %v2316_v18 = vpop.f32.mrb[107].mxu1  ;;  %v2155_v57 = vld [vmem:[%s3469_s13 + $0xd8] sm:$0xff] }
 0x578   : > { %v2416_v37 = vadd.f32 %v2314_v62, %v2136_v25  ;;  %v2317_v49 = vadd.f32 %v4383_v56, %v2316_v18  ;;  %v2153_v18 = vld [vmem:[%s3469_s13 + $0xc8] sm:$0xff] }
 0x579   : > { %2450 = vst [vmem:[%s4395_s28 + $0x50] sm:$0xff] %v2418_v46  ;;  %v2419_v10 = vadd.f32 %v2325_v60, %v2139_v30 }
 0x57a   : > { %2448 = vst [vmem:[%s4395_s28 + $0x40] sm:$0xff] %v2416_v37  ;;  %v2417_v43 = vadd.f32 %v2317_v49, %v2137_v47 }
 0x57b   : > { %2451 = vst [vmem:[%s4395_s28 + $0x58] sm:$0xff] %v2419_v10 }
 0x57c   : > { %2449 = vst [vmem:[%s4395_s28 + $0x48] sm:$0xff] %v2417_v43 }
 0x584   : > { %v2900_v27 = vpop.f32.mrb[108].mxu1 }
 0x585   : > { %v2338_v41 = vadd.f32 %v2900_v27, %v4383_v56  ;;  %v2329_v2 = vpop.f32.mrb[109].mxu1  ;;  %v2158_v27 = vld [vmem:[%s3469_s13 + $0xf0] sm:$0xff] }
 0x586   : > { %v2330_v24 = vadd.f32 %v4383_v56, %v2329_v2  ;;  %v2901_v19 = vpop.f32.mrb[110].mxu1  ;;  %v2156_v2 = vld [vmem:[%s3469_s13 + $0xe0] sm:$0xff] }
 0x587   : > { %v2422_v3 = vadd.f32 %v2338_v41, %v2142_v20  ;;  %v2341_v7 = vadd.f32 %v2901_v19, %v4383_v56  ;;  %v2332_v29 = vpop.f32.mrb[111].mxu1  ;;  %v2159_v19 = vld [vmem:[%s3469_s13 + $0xf8] sm:$0xff] }
 0x588   : > { %v2420_v21 = vadd.f32 %v2330_v24, %v2140_v54  ;;  %v2333_v28 = vadd.f32 %v4383_v56, %v2332_v29  ;;  %v2157_v29 = vld [vmem:[%s3469_s13 + $0xe8] sm:$0xff]  ;;  %s3272_s13 = scalar_lea.vmem %s4489_s8, 4096 }
 0x589   : > { %2454 = vst [vmem:[%s4395_s28 + $0x70] sm:$0xff] %v2422_v3  ;;  %v2423_v36 = vadd.f32 %v2341_v7, %v2143_v53  ;;  %p3273_p12 = scmp.ne.s32.totalorder %s4489_s8, %s3272_s13  ;;  %p3280_p2 = scmp.lt.s32.totalorder %s3278_s17, %s3272_s13 }
 0x58a   : > { %2452 = vst [vmem:[%s4395_s28 + $0x60] sm:$0xff] %v2420_v21  ;;  %v2421_v55 = vadd.f32 %v2333_v28, %v2141_v23 }
 0x58b   : > { %2455 = vst [vmem:[%s4395_s28 + $0x78] sm:$0xff] %v2423_v36  ;;  %p3274_p13 = pnand %p3273_p12, %p3431_p4  ;;  %p3281_p3 = por %p3280_p2, %p3279_p1 }
 0x58c   : > { %2453 = vst [vmem:[%s4395_s28 + $0x68] sm:$0xff] %v2421_v55 }
 0x58d   : > { %p3275_p0 = pneg %p3274_p13 }
 0x58f   : > { %p3282_p5 = pnand %p3281_p3, %p3275_p0 }
 0x594   : > { %v2904_v26 = vpop.f32.mrb[112].mxu1 }
 0x595   : > { %v2354_v22 = vadd.f32 %v2904_v26, %v4383_v56  ;;  %v2345_v5 = vpop.f32.mrb[113].mxu1 }
 0x596   : > { %v2346_v63 = vadd.f32 %v4383_v56, %v2345_v5  ;;  %v2905_v40 = vpop.f32.mrb[114].mxu1 }
 0x597   : > { %v2426_v6 = vadd.f32 %v2354_v22, %v2146_v52  ;;  %v2357_v31 = vadd.f32 %v2905_v40, %v4383_v56  ;;  %v2348_v15 = vpop.f32.mrb[115].mxu1 }
 0x598   : > { %v2424_v59 = vadd.f32 %v2346_v63, %v2144_v51  ;;  %v2349_v42 = vadd.f32 %v4383_v56, %v2348_v15 }
 0x599   : > { %2458 = vst [vmem:[%s4395_s28 + $0x90] sm:$0xff] %v2426_v6  ;;  %v2427_v44 = vadd.f32 %v2357_v31, %v2147_v58 }
 0x59a   : > { %2456 = vst [vmem:[%s4395_s28 + $0x80] sm:$0xff] %v2424_v59  ;;  %v2425_v39 = vadd.f32 %v2349_v42, %v2145_v48 }
 0x59b   : > { %2459 = vst [vmem:[%s4395_s28 + $0x98] sm:$0xff] %v2427_v44 }
 0x59c   : > { %2457 = vst [vmem:[%s4395_s28 + $0x88] sm:$0xff] %v2425_v39 }
 0x5a4   : > { %v2908_v32 = vpop.f32.mrb[116].mxu1 }
 0x5a5   : > { %v2370_v33 = vadd.f32 %v2908_v32, %v4383_v56  ;;  %v2361_v4 = vpop.f32.mrb[117].mxu1 }
 0x5a6   : > { %v2362_v17 = vadd.f32 %v4383_v56, %v2361_v4  ;;  %v2909_v11 = vpop.f32.mrb[118].mxu1 }
 0x5a7   : > { %v2430_v12 = vadd.f32 %v2370_v33, %v2150_v8  ;;  %v2373_v16 = vadd.f32 %v2909_v11, %v4383_v56  ;;  %v2364_v1 = vpop.f32.mrb[119].mxu1 }
 0x5a8   : > { %v2428_v38 = vadd.f32 %v2362_v17, %v2148_v34  ;;  %v2365_v9 = vadd.f32 %v4383_v56, %v2364_v1 }
 0x5a9   : > { %2462 = vst [vmem:[%s4395_s28 + $0xb0] sm:$0xff] %v2430_v12  ;;  %v2431_v45 = vadd.f32 %v2373_v16, %v2151_v14 }
 0x5aa   : > { %2460 = vst [vmem:[%s4395_s28 + $0xa0] sm:$0xff] %v2428_v38  ;;  %v2429_v0 = vadd.f32 %v2365_v9, %v2149_v35 }
 0x5ab   : > { %2463 = vst [vmem:[%s4395_s28 + $0xb8] sm:$0xff] %v2431_v45 }
 0x5ac   : > { %2461 = vst [vmem:[%s4395_s28 + $0xa8] sm:$0xff] %v2429_v0 }
 0x5b4   : > { %v2912_v50 = vpop.f32.mrb[120].mxu1 }
 0x5b5   : > { %v2386_v25 = vadd.f32 %v2912_v50, %v4383_v56  ;;  %v2377_v62 = vpop.f32.mrb[121].mxu1 }
 0x5b6   : > { %v2378_v30 = vadd.f32 %v4383_v56, %v2377_v62  ;;  %v2913_v46 = vpop.f32.mrb[122].mxu1 }
 0x5b7   : > { %v2434_v60 = vadd.f32 %v2386_v25, %v2154_v61  ;;  %v2389_v47 = vadd.f32 %v2913_v46, %v4383_v56  ;;  %v2380_v37 = vpop.f32.mrb[123].mxu1 }
 0x5b8   : > { %v2432_v49 = vadd.f32 %v2378_v30, %v2152_v13  ;;  %v2381_v10 = vadd.f32 %v4383_v56, %v2380_v37 }
 0x5b9   : > { %2466 = vst [vmem:[%s4395_s28 + $0xd0] sm:$0xff] %v2434_v60  ;;  %v2435_v43 = vadd.f32 %v2389_v47, %v2155_v57 }
 0x5ba   : > { %2464 = vst [vmem:[%s4395_s28 + $0xc0] sm:$0xff] %v2432_v49  ;;  %v2433_v20 = vadd.f32 %v2381_v10, %v2153_v18 }
 0x5bb   : > { %2467 = vst [vmem:[%s4395_s28 + $0xd8] sm:$0xff] %v2435_v43 }
 0x5bc   : > { %2465 = vst [vmem:[%s4395_s28 + $0xc8] sm:$0xff] %v2433_v20 }
 0x5c4   : > { %v2916_v41 = vpop.f32.mrb[124].mxu1 }
 0x5c5   : > { %v2402_v54 = vadd.f32 %v2916_v41, %v4383_v56  ;;  %v2393_v24 = vpop.f32.mrb[125].mxu1 }
 0x5c6   : > { %v2394_v53 = vadd.f32 %v4383_v56, %v2393_v24  ;;  %v2917_v3 = vpop.f32.mrb[126].mxu1 }
 0x5c7   : > { %v2438_v7 = vadd.f32 %v2402_v54, %v2158_v27  ;;  %v2405_v23 = vadd.f32 %v2917_v3, %v4383_v56  ;;  %v2396_v21 = vpop.f32.mrb[127].mxu1 }
 0x5c8   : > { %v2436_v28 = vadd.f32 %v2394_v53, %v2156_v2  ;;  %v2397_v36 = vadd.f32 %v4383_v56, %v2396_v21 }
 0x5c9   : > { %2470 = vst [vmem:[%s4395_s28 + $0xf0] sm:$0xff] %v2438_v7  ;;  %v2439_v55 = vadd.f32 %v2405_v23, %v2159_v19 }
 0x5ca   : > { %2468 = vst [vmem:[%s4395_s28 + $0xe0] sm:$0xff] %v2436_v28  ;;  %v2437_v52 = vadd.f32 %v2397_v36, %v2157_v29 }
 0x5cb   : > { %2471 = vst [vmem:[%s4395_s28 + $0xf8] sm:$0xff] %v2439_v55 }
 0x5cc   : > { %2469 = vst [vmem:[%s4395_s28 + $0xe8] sm:$0xff] %v2437_v52 }
 0x5cd   : > { %3285 = shalt.err (!%p3282_p5)
}
 0x5ce   : > { %s3286_s18 = scalar_lea.hbm %s4487_s14, 4096  ;;  %s3290_s27 = scalar_lea.hbm %s4548_s6, 16384 }
 0x5cf   : > { %p3287_p6 = scmp.ne.s32.totalorder %s4487_s14, %s3286_s18  ;;  %p3291_p10 = scmp.lt.u32.totalorder %s4487_s14, %s4548_s6 }
 0x5d0   : > { %p3292_p11 = scmp.lt.u32.totalorder %s3290_s27, %s3286_s18  ;;  %p3294_p13 = scmp.lt.u32.totalorder %s3286_s18, %s4487_s14 }
 0x5d1   : > { %p3288_p7 = pnand %p3287_p6, %p3431_p4 }
 0x5d2   : > { %p3293_p12 = por %p3292_p11, %p3291_p10 }
 0x5d3   : > { %p3289_p9 = pneg %p3288_p7 }
 0x5d4   : > { %p3295_p0 = por %p3294_p13, %p3293_p12 }
 0x5d6   : > { %p3296_p1 = pnand %p3295_p0, %p3289_p9 }
 0x5d8   : > { %3299 = shalt.err (!%p3296_p1)
}
 0x5d9   : > { %s3354_s11 = smov 128   ;;  %s3355_s12 = smov 8  }
 0x5da   : > { %2918 = dma.vmem_to_hbm [thread:$0]  (%p3431_p4), %s4489_s8, 4096, %s4487_s14, %s4496_s24, %s3354_s11, %s3354_s11, %s3355_s12  }
 0x5db PF: > { %p2924_p2 = scmp.ge.s32.totalorder %s3350_s26, 2  ;;  %s2503_s13 = sand.u32 1, %s3330_s21  }
 0x5dc   : > { %s2504_s15 = scalar_lea.sflag [#allocation6], %s2503_s13 }
 0x5dd   : > { %p2921_p3 = pnand %p2924_p2, %p3438_p8 }
 0x5df   : > { %3325 = dma.done.wait (!%p2921_p3), %s2504_s15, 4096  }
 0x5e0   : > { %3327 = vsyncadd (!%p2921_p3), %s2504_s15, 4294963200  ;;  %s19_s26 = sadd.s32 1, %s3350_s26   ;;  %s4590_s21 = smov %s3334_s22 }
 0x5e1   : > { %p16_p5 = scmp.ge.s32.totalorder %s19_s26, 6   ;;  %s4591_s22 = smov %s3338_s23 }
 0x5e2   : > { %s4592_s23 = smov %s3444_s10  ;;  %s4593_s24 = smov %s3346_s25 }
 0x5e3   : > { %s4594_s25 = smov %s4596_s29  ;;  %18 = sbr.rel (!%p16_p5) target bundleno = 4 (0x4), region = 85 }
 0x5ea   :  { %2509 = vsyncpa [#allocation6], 1 }
 0x5eb   :  { %2511 = vsyncpa [#allocation6 + $0x1], 1 }

</bundles_post_ra>
